<compile_context>
chip_gen: v5e
topology: v5e:2x2
jax: 0.10.0
libtpu: 0.0.40
codegen_flags: <defaults>
</compile_context>

<pallas_src>
import functools
import math

import jax
import jax.numpy as jnp
from jax import lax
from jax.experimental import pallas as pl
from jax.experimental.pallas import tpu as pltpu


# -----------------------------------------------------------------------------
# Fused conv3x3 (+ bias + PReLU) Pallas kernel
# -----------------------------------------------------------------------------

_ROWS_TARGET = 2048   # ~output rows per grid step (raise to 4096-8192 on v6e)


def _conv3x3_kernel(x_ref, ext_ref, w_ref, b_ref, a_ref, o_ref, win,
                    *, apply_prelu):
    """One H-tile of a 3x3 'same' conv in NHWC.

    x_ref  : (1, th, Wp, C)   bf16  padded rows [i*th, i*th+th)
    ext_ref: (1, 2,  Wp, C)   bf16  halo rows   [i*th+th, i*th+th+2)
    w_ref  : (9, C, Cout)     bf16  tap-major weights (dy*3+dx)
    b_ref  : (1, Cout)        f32   bias
    a_ref  : (1,)             f32   PReLU alpha (SMEM)
    o_ref  : (1, th, W, Cout) f32
    win    : (th+2, Wp, C)    bf16  VMEM scratch (row window incl. halo)
    """
    th = x_ref.shape[1]
    cin = x_ref.shape[3]
    w_out = o_ref.shape[2]
    cout = o_ref.shape[3]

    win[0:th, :, :] = x_ref[0]
    win[th:th + 2, :, :] = ext_ref[0]

    rows = th * w_out
    acc = jnp.zeros((rows, cout), jnp.float32)
    for dy in range(3):
        for dx in range(3):
            patch = win[dy:dy + th, dx:dx + w_out, :].reshape(rows, cin)
            acc = acc + jnp.dot(patch, w_ref[dy * 3 + dx],
                                preferred_element_type=jnp.float32)
    acc = acc + b_ref[...]
    if apply_prelu:
        a = a_ref[0]
        acc = jnp.where(acc >= 0.0, acc, a * acc)
    o_ref[0] = acc.reshape(th, w_out, cout).astype(o_ref.dtype)


def _pick_th(h, w_eff, rows_target=_ROWS_TARGET):
    """Largest even divisor of h with th*w_eff <= rows_target (>= 2)."""
    assert h % 2 == 0
    cap = max(2, rows_target // max(w_eff, 1))
    best = 2
    d = 2
    while d <= min(h, cap):
        if h % d == 0:
            best = d
        d += 2
    return best


def conv3x3(x, w, bias=None, alpha=None, stride=1):
    """3x3 'same' conv on NHWC f32 input; weights (3,3,Cin,Cout) f32.

    Bias and PReLU (single shared alpha) are fused into the kernel epilogue.
    stride=2 = stride-1 output subsampled at even indices (only used on tiny
    feature maps in this network).
    """
    n, h, wdt, c = x.shape
    cout = w.shape[-1]
    w_eff = ((wdt + 7) // 8) * 8            # pad width to a sublane multiple
    wp = w_eff + 2
    th = _pick_th(h, w_eff)
    nb = h // th

    xp = jnp.pad(x.astype(jnp.bfloat16),
                 ((0, 0), (1, 1), (1, wp - wdt - 1), (0, 0)))
    w9 = jnp.asarray(w, jnp.float32).reshape(9, c, cout).astype(jnp.bfloat16)
    b2 = (jnp.zeros((cout,), jnp.float32) if bias is None
          else jnp.asarray(bias, jnp.float32)).reshape(1, cout)
    apply_prelu = alpha is not None
    a1 = (jnp.asarray(alpha, jnp.float32).reshape(1) if apply_prelu
          else jnp.zeros((1,), jnp.float32))

    kernel = functools.partial(_conv3x3_kernel, apply_prelu=apply_prelu)
    out = pl.pallas_call(
        kernel,
        out_shape=jax.ShapeDtypeStruct((n, h, w_eff, cout), jnp.float32),
        grid=(n, nb),
        in_specs=[
            pl.BlockSpec((1, th, wp, c), lambda bn, i: (bn, i, 0, 0)),
            pl.BlockSpec((1, 2, wp, c),
                         lambda bn, i, _t=th: (bn, (i + 1) * (_t // 2), 0, 0)),
            pl.BlockSpec((9, c, cout), lambda bn, i: (0, 0, 0)),
            pl.BlockSpec((1, cout), lambda bn, i: (0, 0)),
            pl.BlockSpec(memory_space=pltpu.MemorySpace.SMEM),
        ],
        out_specs=pl.BlockSpec((1, th, w_eff, cout), lambda bn, i: (bn, i, 0, 0)),
        scratch_shapes=[pltpu.VMEM((th + 2, wp, c), jnp.bfloat16)],
        compiler_params=pltpu.CompilerParams(
            dimension_semantics=("parallel", "parallel"),
            vmem_limit_bytes=48 * 1024 * 1024,
        ),
    )(xp, xp, w9, b2, a1)

    out = out[:, :, :wdt, :]
    if stride == 2:
        out = out[:, ::2, ::2, :]
    return out


# -----------------------------------------------------------------------------
# Small glue (NHWC), left in jnp: tiny compute, XLA fuses it.
# -----------------------------------------------------------------------------

def calc_mean_std(feat, eps=1e-5):
    n, h, w, c = feat.shape
    flat = feat.reshape(n, h * w, c)
    var = jnp.var(flat, axis=1, ddof=1) + eps      # torch.var default: unbiased
    std = jnp.sqrt(var).reshape(n, 1, 1, c)
    mean = jnp.mean(flat, axis=1).reshape(n, 1, 1, c)
    return mean, std


def din(content_feat, encode_feat):
    c_mean, c_std = calc_mean_std(content_feat)
    e_mean, e_std = calc_mean_std(encode_feat)
    return (content_feat - c_mean) / c_std * e_std + e_mean


def frm(x, p):
    y = jnp.mean(x, axis=(1, 2))                   # AdaptiveAvgPool2d(1)
    y = jnp.maximum(y @ p["w1"] + p["b1"], 0.0)
    y = jax.nn.sigmoid(y @ p["w2"] + p["b2"])
    return x * y[:, None, None, :]


def carb(x, p):
    out = conv3x3(conv3x3(x, p["c1"], alpha=p["a1"]), p["c2"])
    b1 = frm(out, p["ca1"]) + x
    out = conv3x3(b1, p["c3"], alpha=p["a2"])
    b2 = frm(conv3x3(out, p["c4"]), p["ca2"]) + b1
    return b2


def non_local_block(x, p):
    """NONLocalBlock2D: embedded_gaussian, sub_sample=False, bn_layer=False."""
    b, h, w, c = x.shape
    inter = p["g_w"].shape[1]
    flat = x.reshape(b, h * w, c)
    g_x = flat @ p["g_w"] + p["g_b"]               # (b, hw, inter)
    theta = flat @ p["theta_w"] + p["theta_b"]
    phi = flat @ p["phi_w"] + p["phi_b"]
    f = jnp.einsum("bid,bjd->bij", theta, phi)
    f = jax.nn.softmax(f, axis=-1)
    y = jnp.einsum("bij,bjd->bid", f, g_x)
    w_y = y @ p["W_w"] + p["W_b"]                  # (b, hw, c)
    return w_y.reshape(b, h, w, c) + x


def nonlocal_ca(x, p):
    n, h, w, c = x.shape
    h1, w1 = h // 2, w // 2
    quarters = jnp.concatenate(
        [x[:, :h1, :w1], x[:, h1:, :w1], x[:, :h1, w1:], x[:, h1:, w1:]],
        axis=0)
    out = non_local_block(quarters, p)             # shared weights, batched
    lu, ld, ru, rd = jnp.split(out, 4, axis=0)
    top = jnp.concatenate([lu, ru], axis=2)
    bot = jnp.concatenate([ld, rd], axis=2)
    return jnp.concatenate([top, bot], axis=1)


def pixel_shuffle2(x):
    n, h, w, c4 = x.shape
    c = c4 // 4
    x = x.reshape(n, h, w, c, 2, 2)
    x = jnp.transpose(x, (0, 1, 4, 2, 5, 3))
    return x.reshape(n, h * 2, w * 2, c)


def upsample_block(x, p):
    # PReLU (single shared alpha) commutes with PixelShuffle -> fused into the
    # conv epilogue; the shuffle itself is a pure layout op afterwards.
    # TODO(synk): fold the pixel-shuffle layout into the conv out_spec to save
    # one HBM round-trip per stage.
    y = conv3x3(x, p["w"], bias=p["b"], alpha=p["alpha"])
    return pixel_shuffle2(y)


def branch6_forward(params, x):
    x = jnp.transpose(x, (0, 2, 3, 1))             # NCHW -> NHWC once
    out = conv3x3(x, params["conv_input"], alpha=params["relu_a"])
    c = out
    s = out
    for idx in range(8):
        stride = 2 if idx % 2 == 1 else 1          # s_conv2/4/6/8 stride 2
        s = conv3x3(s, params["s_convs"][idx], stride=stride)
        c = din(carb(c, params["carbs"][idx]), s)
    c = nonlocal_ca(c, params["nl"])
    combine = out + c
    up = combine
    for up_p in params["ups"]:
        up = upsample_block(up, up_p)
    clean = conv3x3(up, params["convt_shape1"])
    return jnp.transpose(clean, (0, 3, 1, 2))      # back to NCHW


# -----------------------------------------------------------------------------
# Parameter construction (matches Branch6's init loop: every Conv2d weight
# ~ N(0, sqrt(2/(k*k*Cout))), every conv bias zeroed; PReLU alphas = 0.25)
# -----------------------------------------------------------------------------

class _KeyGen:
    def __init__(self, key):
        self._key = key

    def __call__(self):
        self._key, sub = jax.random.split(self._key)
        return sub


def _conv_w(kg, kh, kw, cin, cout):
    std = math.sqrt(2.0 / (kh * kw * cout))
    return jax.random.normal(kg(), (kh, kw, cin, cout), jnp.float32) * std


def _conv1x1_params(kg, cin, cout):
    std = math.sqrt(2.0 / cout)
    w = jax.random.normal(kg(), (cin, cout), jnp.float32) * std
    return w, jnp.zeros((cout,), jnp.float32)


def _carb_params(kg, ch=64):
    p = {k: _conv_w(kg, 3, 3, ch, ch) for k in ("c1", "c2", "c3", "c4")}
    p["a1"] = jnp.array([0.25], jnp.float32)
    p["a2"] = jnp.array([0.25], jnp.float32)
    for name in ("ca1", "ca2"):
        w1, b1 = _conv1x1_params(kg, ch, ch // 16)
        w2, b2 = _conv1x1_params(kg, ch // 16, ch)
        p[name] = {"w1": w1, "b1": b1, "w2": w2, "b2": b2}
    return p


def init_branch6_params(kg):
    ch = 64
    params = {
        "conv_input": _conv_w(kg, 3, 3, ch, ch),
        "relu_a": jnp.array([0.25], jnp.float32),
        "carbs": [_carb_params(kg, ch) for _ in range(8)],
        "s_convs": [_conv_w(kg, 3, 3, ch, ch) for _ in range(8)],
        "ups": [{"w": _conv_w(kg, 3, 3, ch, 256),
                 "b": jnp.zeros((256,), jnp.float32),
                 "alpha": jnp.array([0.25], jnp.float32)} for _ in range(5)],
        "convt_shape1": _conv_w(kg, 3, 3, ch, 3),
    }
    g_w, g_b = _conv1x1_params(kg, ch, ch // 8)
    th_w, th_b = _conv1x1_params(kg, ch, ch // 8)
    ph_w, ph_b = _conv1x1_params(kg, ch, ch // 8)
    W_w, W_b = _conv1x1_params(kg, ch // 8, ch)   # re-initialized by init loop
    params["nl"] = dict(g_w=g_w, g_b=g_b, theta_w=th_w, theta_b=th_b,
                        phi_w=ph_w, phi_b=ph_b, W_w=W_w, W_b=W_b)
    return params


# -----------------------------------------------------------------------------
# Main
# -----------------------------------------------------------------------------

if __name__ == "__main__":
    kg = _KeyGen(jax.random.PRNGKey(0))

    # ---- quick correctness check of the fused conv kernel vs lax.conv ----
    xt = jax.random.normal(kg(), (1, 8, 8, 16), jnp.float32)
    wt = jax.random.normal(kg(), (3, 3, 16, 8), jnp.float32) * 0.1
    bt = jax.random.normal(kg(), (8,), jnp.float32) * 0.1
    ref = lax.conv_general_dilated(
        xt, wt, (1, 1), ((1, 1), (1, 1)),
        dimension_numbers=("NHWC", "HWIO", "NHWC"),
        precision=lax.Precision.HIGHEST) + bt
    ref = jnp.where(ref >= 0, ref, 0.25 * ref)
    got = conv3x3(xt, wt, bias=bt, alpha=jnp.array([0.25], jnp.float32))
    assert jnp.allclose(got, ref, atol=5e-2, rtol=5e-2), "fused conv3x3 mismatch"

    ref2 = lax.conv_general_dilated(
        xt, wt, (2, 2), ((1, 1), (1, 1)),
        dimension_numbers=("NHWC", "HWIO", "NHWC"),
        precision=lax.Precision.HIGHEST)
    got2 = conv3x3(xt, wt, stride=2)
    assert jnp.allclose(got2, ref2, atol=5e-2, rtol=5e-2), "stride-2 conv mismatch"

    # ---- full Branch6 forward at the smallest valid size ----
    # 64 input channels are required; spatial (32, 16) is the smallest size for
    # which the last encode feature (H/16 x W/16 = 2x1) still has >1 element
    # for the unbiased variance in din.  Output is x32-upsampled, 3 channels.
    params = init_branch6_params(kg)
    x = jax.random.normal(kg(), (1, 64, 32, 16), jnp.float32)

    fwd = jax.jit(branch6_forward)
    out = fwd(params, x)
    jax.block_until_ready(out)

    assert out.shape == (1, 3, 32 * 32, 16 * 32), out.shape
    assert bool(jnp.all(jnp.isfinite(out)))
    print("KERNEL_OK")
</pallas_src>

<mosaic_0001>
module attributes {stable_mosaic.version = 11 : i64} {
  func.func @_conv3x3_kernel(%arg0: i32, %arg1: i32, %arg2: memref<1x8x10x16xbf16, #tpu.memory_space<vmem>>, %arg3: memref<1x2x10x16xbf16, #tpu.memory_space<vmem>>, %arg4: memref<9x16x8xbf16, #tpu.memory_space<vmem>>, %arg5: memref<1x8xf32, #tpu.memory_space<vmem>>, %arg6: memref<1xf32, #tpu.memory_space<smem>>, %arg7: memref<1x8x8x8xf32, #tpu.memory_space<vmem>>, %arg8: memref<10x10x16xbf16, #tpu.memory_space<vmem>>) attributes {dimension_semantics = [#tpu.dimension_semantics<parallel>, #tpu.dimension_semantics<parallel>], iteration_bounds = array<i64: 1, 1>, scalar_prefetch = 0 : i64, scratch_operands = 1 : i64, tpu.core_type = #tpu.core_type<tc>, window_params = [{transform_indices = @transform_0, window_bounds = array<i64: 1, 8, 10, 16>}, {transform_indices = @transform_1, window_bounds = array<i64: 1, 2, 10, 16>}, {pipeline_mode = #tpu.pipeline_mode<synchronous>, transform_indices = @transform_2, window_bounds = array<i64: 9, 16, 8>}, {pipeline_mode = #tpu.pipeline_mode<synchronous>, transform_indices = @transform_3, window_bounds = array<i64: 1, 8>}, {transform_indices = @transform_4, window_bounds = array<i64: 1>}, {transform_indices = @transform_5, window_bounds = array<i64: 1, 8, 8, 8>}]} {
    %c0 = arith.constant 0 : index
    %c0_0 = arith.constant 0 : index
    %c0_1 = arith.constant 0 : index
    %c0_2 = arith.constant 0 : index
    %0 = vector.load %arg2[%c0, %c0_0, %c0_1, %c0_2] : memref<1x8x10x16xbf16, #tpu.memory_space<vmem>>, vector<1x8x10x16xbf16>
    %1 = vector.shape_cast %0 : vector<1x8x10x16xbf16> to vector<8x10x16xbf16>
    %c0_3 = arith.constant 0 : index
    %c0_4 = arith.constant 0 : index
    %c0_5 = arith.constant 0 : index
    %2 = vector.load %arg8[%c0_3, %c0_4, %c0_5] : memref<10x10x16xbf16, #tpu.memory_space<vmem>>, vector<8x10x16xbf16>
    tpu.vector_store %arg8[%c0_3, %c0_4, %c0_5], %1 {strides = array<i32>} : memref<10x10x16xbf16, #tpu.memory_space<vmem>>, vector<8x10x16xbf16>,
    %c0_6 = arith.constant 0 : index
    %c0_7 = arith.constant 0 : index
    %c0_8 = arith.constant 0 : index
    %c0_9 = arith.constant 0 : index
    %3 = vector.load %arg3[%c0_6, %c0_7, %c0_8, %c0_9] : memref<1x2x10x16xbf16, #tpu.memory_space<vmem>>, vector<1x2x10x16xbf16>
    %4 = vector.shape_cast %3 : vector<1x2x10x16xbf16> to vector<2x10x16xbf16>
    %c8 = arith.constant 8 : index
    %c0_10 = arith.constant 0 : index
    %c0_11 = arith.constant 0 : index
    %5 = vector.load %arg8[%c8, %c0_10, %c0_11] : memref<10x10x16xbf16, #tpu.memory_space<vmem>>, vector<2x10x16xbf16>
    tpu.vector_store %arg8[%c8, %c0_10, %c0_11], %4 {strides = array<i32>} : memref<10x10x16xbf16, #tpu.memory_space<vmem>>, vector<2x10x16xbf16>,
    %cst = arith.constant 0.000000e+00 : f32
    %6 = vector.broadcast %cst : f32 to vector<64x8xf32>
    %c0_12 = arith.constant 0 : index
    %c0_13 = arith.constant 0 : index
    %c0_14 = arith.constant 0 : index
    %7 = vector.load %arg8[%c0_12, %c0_13, %c0_14] : memref<10x10x16xbf16, #tpu.memory_space<vmem>>, vector<8x8x16xbf16>
    %8 = vector.shape_cast %7 : vector<8x8x16xbf16> to vector<64x16xbf16>
    %c0_15 = arith.constant 0 : index
    %c0_16 = arith.constant 0 : index
    %c0_17 = arith.constant 0 : index
    %9 = vector.load %arg4[%c0_15, %c0_16, %c0_17] : memref<9x16x8xbf16, #tpu.memory_space<vmem>>, vector<1x16x8xbf16>
    %10 = vector.shape_cast %9 : vector<1x16x8xbf16> to vector<16x8xbf16>
    %cst_18 = arith.constant dense<0.000000e+00> : vector<64x8xf32>
    %11 = tpu.matmul %8, %10, %cst_18 {dimension_numbers = #tpu.dot_dimension_numbers<[1], [0], [0], [1], [0, 0, 1, 1], [], []>} : vector<64x16xbf16>, vector<16x8xbf16>, vector<64x8xf32> -> vector<64x8xf32>
    %12 = arith.addf %6, %11 : vector<64x8xf32>
    %c0_19 = arith.constant 0 : index
    %c1 = arith.constant 1 : index
    %c0_20 = arith.constant 0 : index
    %13 = vector.load %arg8[%c0_19, %c1, %c0_20] : memref<10x10x16xbf16, #tpu.memory_space<vmem>>, vector<8x8x16xbf16>
    %14 = vector.shape_cast %13 : vector<8x8x16xbf16> to vector<64x16xbf16>
    %c1_21 = arith.constant 1 : index
    %c0_22 = arith.constant 0 : index
    %c0_23 = arith.constant 0 : index
    %15 = vector.load %arg4[%c1_21, %c0_22, %c0_23] : memref<9x16x8xbf16, #tpu.memory_space<vmem>>, vector<1x16x8xbf16>
    %16 = vector.shape_cast %15 : vector<1x16x8xbf16> to vector<16x8xbf16>
    %cst_24 = arith.constant dense<0.000000e+00> : vector<64x8xf32>
    %17 = tpu.matmul %14, %16, %cst_24 {dimension_numbers = #tpu.dot_dimension_numbers<[1], [0], [0], [1], [0, 0, 1, 1], [], []>} : vector<64x16xbf16>, vector<16x8xbf16>, vector<64x8xf32> -> vector<64x8xf32>
    %18 = arith.addf %12, %17 : vector<64x8xf32>
    %c0_25 = arith.constant 0 : index
    %c2 = arith.constant 2 : index
    %c0_26 = arith.constant 0 : index
    %19 = vector.load %arg8[%c0_25, %c2, %c0_26] : memref<10x10x16xbf16, #tpu.memory_space<vmem>>, vector<8x8x16xbf16>
    %20 = vector.shape_cast %19 : vector<8x8x16xbf16> to vector<64x16xbf16>
    %c2_27 = arith.constant 2 : index
    %c0_28 = arith.constant 0 : index
    %c0_29 = arith.constant 0 : index
    %21 = vector.load %arg4[%c2_27, %c0_28, %c0_29] : memref<9x16x8xbf16, #tpu.memory_space<vmem>>, vector<1x16x8xbf16>
    %22 = vector.shape_cast %21 : vector<1x16x8xbf16> to vector<16x8xbf16>
    %cst_30 = arith.constant dense<0.000000e+00> : vector<64x8xf32>
    %23 = tpu.matmul %20, %22, %cst_30 {dimension_numbers = #tpu.dot_dimension_numbers<[1], [0], [0], [1], [0, 0, 1, 1], [], []>} : vector<64x16xbf16>, vector<16x8xbf16>, vector<64x8xf32> -> vector<64x8xf32>
    %24 = arith.addf %18, %23 : vector<64x8xf32>
    %c1_31 = arith.constant 1 : index
    %c0_32 = arith.constant 0 : index
    %c0_33 = arith.constant 0 : index
    %25 = vector.load %arg8[%c1_31, %c0_32, %c0_33] : memref<10x10x16xbf16, #tpu.memory_space<vmem>>, vector<8x8x16xbf16>
    %26 = vector.shape_cast %25 : vector<8x8x16xbf16> to vector<64x16xbf16>
    %c3 = arith.constant 3 : index
    %c0_34 = arith.constant 0 : index
    %c0_35 = arith.constant 0 : index
    %27 = vector.load %arg4[%c3, %c0_34, %c0_35] : memref<9x16x8xbf16, #tpu.memory_space<vmem>>, vector<1x16x8xbf16>
    %28 = vector.shape_cast %27 : vector<1x16x8xbf16> to vector<16x8xbf16>
    %cst_36 = arith.constant dense<0.000000e+00> : vector<64x8xf32>
    %29 = tpu.matmul %26, %28, %cst_36 {dimension_numbers = #tpu.dot_dimension_numbers<[1], [0], [0], [1], [0, 0, 1, 1], [], []>} : vector<64x16xbf16>, vector<16x8xbf16>, vector<64x8xf32> -> vector<64x8xf32>
    %30 = arith.addf %24, %29 : vector<64x8xf32>
    %c1_37 = arith.constant 1 : index
    %c1_38 = arith.constant 1 : index
    %c0_39 = arith.constant 0 : index
    %31 = vector.load %arg8[%c1_37, %c1_38, %c0_39] : memref<10x10x16xbf16, #tpu.memory_space<vmem>>, vector<8x8x16xbf16>
    %32 = vector.shape_cast %31 : vector<8x8x16xbf16> to vector<64x16xbf16>
    %c4 = arith.constant 4 : index
    %c0_40 = arith.constant 0 : index
    %c0_41 = arith.constant 0 : index
    %33 = vector.load %arg4[%c4, %c0_40, %c0_41] : memref<9x16x8xbf16, #tpu.memory_space<vmem>>, vector<1x16x8xbf16>
    %34 = vector.shape_cast %33 : vector<1x16x8xbf16> to vector<16x8xbf16>
    %cst_42 = arith.constant dense<0.000000e+00> : vector<64x8xf32>
    %35 = tpu.matmul %32, %34, %cst_42 {dimension_numbers = #tpu.dot_dimension_numbers<[1], [0], [0], [1], [0, 0, 1, 1], [], []>} : vector<64x16xbf16>, vector<16x8xbf16>, vector<64x8xf32> -> vector<64x8xf32>
    %36 = arith.addf %30, %35 : vector<64x8xf32>
    %c1_43 = arith.constant 1 : index
    %c2_44 = arith.constant 2 : index
    %c0_45 = arith.constant 0 : index
    %37 = vector.load %arg8[%c1_43, %c2_44, %c0_45] : memref<10x10x16xbf16, #tpu.memory_space<vmem>>, vector<8x8x16xbf16>
    %38 = vector.shape_cast %37 : vector<8x8x16xbf16> to vector<64x16xbf16>
    %c5 = arith.constant 5 : index
    %c0_46 = arith.constant 0 : index
    %c0_47 = arith.constant 0 : index
    %39 = vector.load %arg4[%c5, %c0_46, %c0_47] : memref<9x16x8xbf16, #tpu.memory_space<vmem>>, vector<1x16x8xbf16>
    %40 = vector.shape_cast %39 : vector<1x16x8xbf16> to vector<16x8xbf16>
    %cst_48 = arith.constant dense<0.000000e+00> : vector<64x8xf32>
    %41 = tpu.matmul %38, %40, %cst_48 {dimension_numbers = #tpu.dot_dimension_numbers<[1], [0], [0], [1], [0, 0, 1, 1], [], []>} : vector<64x16xbf16>, vector<16x8xbf16>, vector<64x8xf32> -> vector<64x8xf32>
    %42 = arith.addf %36, %41 : vector<64x8xf32>
    %c2_49 = arith.constant 2 : index
    %c0_50 = arith.constant 0 : index
    %c0_51 = arith.constant 0 : index
    %43 = vector.load %arg8[%c2_49, %c0_50, %c0_51] : memref<10x10x16xbf16, #tpu.memory_space<vmem>>, vector<8x8x16xbf16>
    %44 = vector.shape_cast %43 : vector<8x8x16xbf16> to vector<64x16xbf16>
    %c6 = arith.constant 6 : index
    %c0_52 = arith.constant 0 : index
    %c0_53 = arith.constant 0 : index
    %45 = vector.load %arg4[%c6, %c0_52, %c0_53] : memref<9x16x8xbf16, #tpu.memory_space<vmem>>, vector<1x16x8xbf16>
    %46 = vector.shape_cast %45 : vector<1x16x8xbf16> to vector<16x8xbf16>
    %cst_54 = arith.constant dense<0.000000e+00> : vector<64x8xf32>
    %47 = tpu.matmul %44, %46, %cst_54 {dimension_numbers = #tpu.dot_dimension_numbers<[1], [0], [0], [1], [0, 0, 1, 1], [], []>} : vector<64x16xbf16>, vector<16x8xbf16>, vector<64x8xf32> -> vector<64x8xf32>
    %48 = arith.addf %42, %47 : vector<64x8xf32>
    %c2_55 = arith.constant 2 : index
    %c1_56 = arith.constant 1 : index
    %c0_57 = arith.constant 0 : index
    %49 = vector.load %arg8[%c2_55, %c1_56, %c0_57] : memref<10x10x16xbf16, #tpu.memory_space<vmem>>, vector<8x8x16xbf16>
    %50 = vector.shape_cast %49 : vector<8x8x16xbf16> to vector<64x16xbf16>
    %c7 = arith.constant 7 : index
    %c0_58 = arith.constant 0 : index
    %c0_59 = arith.constant 0 : index
    %51 = vector.load %arg4[%c7, %c0_58, %c0_59] : memref<9x16x8xbf16, #tpu.memory_space<vmem>>, vector<1x16x8xbf16>
    %52 = vector.shape_cast %51 : vector<1x16x8xbf16> to vector<16x8xbf16>
    %cst_60 = arith.constant dense<0.000000e+00> : vector<64x8xf32>
    %53 = tpu.matmul %50, %52, %cst_60 {dimension_numbers = #tpu.dot_dimension_numbers<[1], [0], [0], [1], [0, 0, 1, 1], [], []>} : vector<64x16xbf16>, vector<16x8xbf16>, vector<64x8xf32> -> vector<64x8xf32>
    %54 = arith.addf %48, %53 : vector<64x8xf32>
    %c2_61 = arith.constant 2 : index
    %c2_62 = arith.constant 2 : index
    %c0_63 = arith.constant 0 : index
    %55 = vector.load %arg8[%c2_61, %c2_62, %c0_63] : memref<10x10x16xbf16, #tpu.memory_space<vmem>>, vector<8x8x16xbf16>
    %56 = vector.shape_cast %55 : vector<8x8x16xbf16> to vector<64x16xbf16>
    %c8_64 = arith.constant 8 : index
    %c0_65 = arith.constant 0 : index
    %c0_66 = arith.constant 0 : index
    %57 = vector.load %arg4[%c8_64, %c0_65, %c0_66] : memref<9x16x8xbf16, #tpu.memory_space<vmem>>, vector<1x16x8xbf16>
    %58 = vector.shape_cast %57 : vector<1x16x8xbf16> to vector<16x8xbf16>
    %cst_67 = arith.constant dense<0.000000e+00> : vector<64x8xf32>
    %59 = tpu.matmul %56, %58, %cst_67 {dimension_numbers = #tpu.dot_dimension_numbers<[1], [0], [0], [1], [0, 0, 1, 1], [], []>} : vector<64x16xbf16>, vector<16x8xbf16>, vector<64x8xf32> -> vector<64x8xf32>
    %60 = arith.addf %54, %59 : vector<64x8xf32>
    %c0_68 = arith.constant 0 : index
    %c0_69 = arith.constant 0 : index
    %61 = vector.load %arg5[%c0_68, %c0_69] : memref<1x8xf32, #tpu.memory_space<vmem>>, vector<1x8xf32>
    %62 = vector.broadcast %61 : vector<1x8xf32> to vector<64x8xf32>
    %63 = arith.addf %60, %62 : vector<64x8xf32>
    %c0_70 = arith.constant 0 : index
    %64 = memref.load %arg6[%c0_70] : memref<1xf32, #tpu.memory_space<smem>>
    %cst_71 = arith.constant 0.000000e+00 : f32
    %65 = vector.broadcast %cst_71 : f32 to vector<64x8xf32>
    %66 = arith.cmpf oge, %63, %65 : vector<64x8xf32>
    %67 = vector.broadcast %64 : f32 to vector<64x8xf32>
    %68 = arith.mulf %67, %63 : vector<64x8xf32>
    %69 = arith.select %66, %63, %68 : vector<64x8xi1>, vector<64x8xf32>
    %70 = vector.shape_cast %69 : vector<64x8xf32> to vector<8x8x8xf32>
    %c0_72 = arith.constant 0 : index
    %c0_73 = arith.constant 0 : index
    %c0_74 = arith.constant 0 : index
    %c0_75 = arith.constant 0 : index
    %71 = vector.load %arg7[%c0_72, %c0_73, %c0_74, %c0_75] : memref<1x8x8x8xf32, #tpu.memory_space<vmem>>, vector<1x8x8x8xf32>
    %72 = vector.shape_cast %71 : vector<1x8x8x8xf32> to vector<8x8x8xf32>
    %73 = vector.shape_cast %70 : vector<8x8x8xf32> to vector<1x8x8x8xf32>
    tpu.vector_store %arg7[%c0_72, %c0_73, %c0_74, %c0_75], %73 {strides = array<i32>} : memref<1x8x8x8xf32, #tpu.memory_space<vmem>>, vector<1x8x8x8xf32>,
    return
  }
  func.func @transform_0(%arg0: i32, %arg1: i32) -> (i32, i32, i32, i32) {
    %c0_i32 = arith.constant 0 : i32
    %c0_i32_0 = arith.constant 0 : i32
    %c0_i32_1 = arith.constant 0 : i32
    return %arg0, %arg1, %c0_i32, %c0_i32_0 : i32, i32, i32, i32
  }
  func.func @transform_1(%arg0: i32, %arg1: i32) -> (i32, i32, i32, i32) {
    %c1_i32 = arith.constant 1 : i32
    %0 = arith.addi %arg1, %c1_i32 : i32
    %c4_i32 = arith.constant 4 : i32
    %1 = arith.muli %0, %c4_i32 : i32
    %c0_i32 = arith.constant 0 : i32
    %c0_i32_0 = arith.constant 0 : i32
    %c0_i32_1 = arith.constant 0 : i32
    return %arg0, %1, %c0_i32, %c0_i32_0 : i32, i32, i32, i32
  }
  func.func @transform_2(%arg0: i32, %arg1: i32) -> (i32, i32, i32) {
    %c0_i32 = arith.constant 0 : i32
    %c0_i32_0 = arith.constant 0 : i32
    %c0_i32_1 = arith.constant 0 : i32
    %c0_i32_2 = arith.constant 0 : i32
    return %c0_i32, %c0_i32_0, %c0_i32_1 : i32, i32, i32
  }
  func.func @transform_3(%arg0: i32, %arg1: i32) -> (i32, i32) {
    %c0_i32 = arith.constant 0 : i32
    %c0_i32_0 = arith.constant 0 : i32
    %c0_i32_1 = arith.constant 0 : i32
    return %c0_i32, %c0_i32_0 : i32, i32
  }
  func.func @transform_4(%arg0: i32, %arg1: i32) -> i32 {
    %c0_i32 = arith.constant 0 : i32
    %c0_i32_0 = arith.constant 0 : i32
    return %c0_i32 : i32
  }
  func.func @transform_5(%arg0: i32, %arg1: i32) -> (i32, i32, i32, i32) {
    %c0_i32 = arith.constant 0 : i32
    %c0_i32_0 = arith.constant 0 : i32
    %c0_i32_1 = arith.constant 0 : i32
    return %arg0, %arg1, %c0_i32, %c0_i32_0 : i32, i32, i32, i32
  }
}

</mosaic_0001>

<bundles_post_ra>
// kernel: tpu_custom_call.1
= control target key start
LH: loop header
LB: loop body
LE: loop exit
PB: predicated region body
PF: predicated region fallthrough
CT: control target
= control target key end

     0   :  { %11 = vsyncpa [#allocation5], 0  ;;  %s2063_s0 = inlined_call_operand.vmem [shape: bf16[1,10,10,16], index: 0, kind: input, shape index: {}]   ;;  %s2064_s1 = inlined_call_operand.hbm [shape: bf16[1,10,10,16], index: 1, kind: input, shape index: {}]   ;;  %s2065_s2 = inlined_call_operand.vmem [shape: bf16[9,16,8], index: 2, kind: input, shape index: {}]   ;;  %s2066_s3 = inlined_call_operand.vmem [shape: f32[1,8], index: 3, kind: input, shape index: {}]   ;;  %s2067_s4 = inlined_call_operand.<no memory space> [shape: f32[1], index: 4, kind: input, shape index: {}]   ;;  %s2068_s5 = inlined_call_operand.hbm [shape: f32[1,8,8,8], index: 5, kind: output, shape index: {}]  }
   0x1   :  { %12 = vsyncpa [#allocation6], 0  ;;  %s1371_s20 = scalar_lea.hbm %s2064_s1, 64  ;;  %s1615_s22 = smov [#allocation4]  }
   0x2   :  { %s25_s21 = sshll.u32 %s1371_s20, 4  ;;  %s27_s23 = sshll.u32 %s1615_s22, 4  ;;  %s26_s21 = int_to_ptr.hbm [resolvable:$true] %s25_s21  ;;  %s28_s23 = int_to_ptr.vmem [resolvable:$true] %s27_s23 }
   0x3   :  { %s1616_s24 = smov 64   ;;  %s1617_s25 = smov 4  }
   0x4   :  { %33 = dma.hbm_to_vmem [thread:$0]  %s26_s21, 256, %s28_s23, [#allocation5], %s1616_s24, %s1616_s24, %s1617_s25  }
   0x5   :  { %1611 = dma.done.wait [#allocation5], 256  }
   0x6   :  { %1612 = vsyncadd [#allocation5], 4294967040  ;;  %vm64_vm0 = vcmask 125952   ;;  %vm66_vm1 = vcmask 122880   ;;  %v1537_v0 = vld [vmem:[%s2065_s2 + $0x8] sm:$0xff]  ;;  %v1538_v10 = vld [vmem:[%s2065_s2 + $0x10] sm:$0xff] }
   0x7   :  { %v52_v1 = vld [vmem:[%s2063_s0 + $0x10] sm:$0xf]  ;;  %v53_v2 = vld [vmem:[%s2063_s0 + $0x14] sm:$0x1]  ;;  %v54_v3 = vld [vmem:[%s2063_s0 + $0x18] sm:$0xf]  ;;  %1553 = vmatpush.bf16.msra.mxu1 %v1537_v0  ;;  %1554 = vmatpush.bf16.msra.mxu2 %v1537_v0 }
   0x8   :  { %v55_v4 = vld [vmem:[%s2063_s0 + $0x1c] sm:$0x1]  ;;  %70 = vst.msk [vmem:[#allocation2 + $0x10] sm:$0xf] %vm64_vm0, %v52_v1  ;;  %v56_v5 = vld [vmem:[%s2063_s0 + $0x20] sm:$0xf]  ;;  %1555 = vmatpush.bf16.msra.mxu3 %v1537_v0  ;;  %265 = vmatpush.bf16.msra.mxu0 %v1537_v0 }
   0x9   :  { %71 = vst.msk [vmem:[#allocation2 + $0x14] sm:$0x1] %vm66_vm1, %v53_v2  ;;  %v57_v6 = vld [vmem:[%s2063_s0 + $0x24] sm:$0x1]  ;;  %v58_v7 = vld [vmem:[%s2063_s0 + $0x28] sm:$0xf] }
   0xa   :  { %72 = vst.msk [vmem:[#allocation2 + $0x18] sm:$0xf] %vm64_vm0, %v54_v3  ;;  %vm109_vm2 = vsmask.f32 3328  ;;  %v59_v8 = vld [vmem:[%s2063_s0 + $0x2c] sm:$0x1] }
   0xb   :  { %73 = vst.msk [vmem:[#allocation2 + $0x1c] sm:$0x1] %vm66_vm1, %v55_v4  ;;  %v60_v9 = vld [vmem:[%s2063_s0 + $0x30] sm:$0xf]  ;;  %vm110_vm3 = vsmask.f32 7440  ;;  %453 = vmatpush.bf16.msrb.mxu2 %v1538_v10 }
   0xc   :  { %74 = vst.msk [vmem:[#allocation2 + $0x20] sm:$0xf] %vm64_vm0, %v56_v5  ;;  %v61_v11 = vld [vmem:[%s2063_s0 + $0x34] sm:$0x1]  ;;  %v62_v13 = vld [vmem:[%s2063_s0 + $0x38] sm:$0xf]  ;;  %vm1726_vm4 = vmor %vm109_vm2, %vm110_vm3 }
   0xd   :  { %75 = vst.msk [vmem:[#allocation2 + $0x24] sm:$0x1] %vm66_vm1, %v57_v6  ;;  %v1543_v19 = vld [vmem:[%s2065_s2 + $0x18] sm:$0xff]  ;;  %v48_v34 = vld [vmem:[%s2063_s0] sm:$0xf]  ;;  %vm245_vm5 = vcmask 130048  }
   0xe   :  { %76 = vst.msk [vmem:[#allocation2 + $0x28] sm:$0xf] %vm64_vm0, %v58_v7  ;;  %v63_v25 = vld [vmem:[%s2063_s0 + $0x3c] sm:$0x1]  ;;  %540 = vmatpush.bf16.msrb.mxu3 %v1543_v19  ;;  %v1536_v35 = vld [vmem:[%s2065_s2] sm:$0xff]  ;;  %vm378_vm6 = vcmask 1042432  }
   0xf   :  { %v93_v12 = vld [vmem:[#allocation2 + $0x10] sm:$0xf]  ;;  %77 = vst.msk [vmem:[#allocation2 + $0x2c] sm:$0x1] %vm66_vm1, %v59_v8  ;;  %v1544_v41 = vld [vmem:[%s2065_s2 + $0x20] sm:$0xff]  ;;  %332 = vmatpush.bf16.msrb.mxu1 %v1536_v35  ;;  %vm379_vm7 = vcmask 1046532  }
  0x10   :  { %v1701_v14 = vld [vmem:[#allocation2 + $0x14] sm:$0x1]  ;;  %v141_v15 = vshrl.u32 %v93_v12, 16  ;;  %v144_v16 = vshll.u32 %v93_v12, 16  ;;  %78 = vst.msk [vmem:[#allocation2 + $0x30] sm:$0xf] %vm64_vm0, %v60_v9  ;;  %738 = vmatpush.bf16.msrb.mxu0 %v1544_v41  ;;  %vm1782_vm8 = vmor %vm378_vm6, %vm379_vm7 }
  0x11   :  { %v94_v17 = vld [vmem:[#allocation2 + $0x18] sm:$0xf]  ;;  %v150_v18 = vshll.u32 %v1701_v14, 16  ;;  %79 = vst.msk [vmem:[#allocation2 + $0x34] sm:$0x1] %vm66_vm1, %v61_v11  ;;  %vm1343_vm10 = vcmask 64512  }
  0x12   :  { %v1709_v20 = vld [vmem:[#allocation2 + $0x1c] sm:$0x1]  ;;  %v143_v21 = vrot.slane %v141_v15, 4  ;;  %v146_v22 = vrot.slane %v144_v16, 5  ;;  %v155_v23 = vshrl.u32 %v94_v17, 16  ;;  %v158_v24 = vshll.u32 %v94_v17, 16 }
  0x13   :  { %v152_v26 = vrot.slane %v150_v18, 5  ;;  %v164_v27 = vshll.u32 %v1709_v20, 16  ;;  %v95_v28 = vld [vmem:[#allocation2 + $0x20] sm:$0xf]  ;;  %80 = vst.msk [vmem:[#allocation2 + $0x38] sm:$0xf] %vm64_vm0, %v62_v13 }
  0x14   :  { %v147_v29 = vor.u32 %v146_v22, %v143_v21  ;;  %v157_v30 = vrot.slane %v155_v23, 4  ;;  %v160_v31 = vrot.slane %v158_v24, 5  ;;  %v1716_v32 = vld [vmem:[#allocation2 + $0x24] sm:$0x1]  ;;  %v169_v33 = vshrl.u32 %v95_v28, 16  ;;  %s1358_s28 = sshll.u32 %s2068_s5, 4  ;;  %s1359_s28 = int_to_ptr.hbm [resolvable:$true] %s1358_s28 }
  0x15   :  { %v166_v37 = vrot.slane %v164_v27, 5  ;;  %v96_v38 = vld [vmem:[#allocation2 + $0x28] sm:$0xf]  ;;  %v172_v39 = vshll.u32 %v95_v28, 16  ;;  %v178_v40 = vshll.u32 %v1716_v32, 16  ;;  %s1619_s29 = smov 128  }
  0x16   :  { %v148_v42 = vrot.slane %v147_v29, 4  ;;  %v161_v43 = vor.u32 %v160_v31, %v157_v30  ;;  %v1734_v44 = vld [vmem:[#allocation2 + $0x2c] sm:$0x1]  ;;  %v171_v45 = vrot.slane %v169_v33, 4  ;;  %v183_v46 = vshrl.u32 %v96_v38, 16  ;;  %v1550_v29 = vld [vmem:[%s2065_s2 + $0x30] sm:$0xff] }
  0x17   :  { %v49_v47 = vld [vmem:[%s2063_s0 + $0x4] sm:$0x1]  ;;  %v174_v48 = vrot.slane %v172_v39, 5  ;;  %v180_v49 = vrot.slane %v178_v40, 5  ;;  %v186_v50 = vshll.u32 %v96_v38, 16  ;;  %v192_v51 = vshll.u32 %v1734_v44, 16 }
  0x18   :  { %81 = vst.msk [vmem:[#allocation2 + $0x3c] sm:$0x1] %vm66_vm1, %v63_v25  ;;  %v50_v52 = vld [vmem:[%s2063_s0 + $0x8] sm:$0xf]  ;;  %v153_v53 = vsel %vm1726_vm4, %v148_v42, %v152_v26  ;;  %v162_v54 = vrot.slane %v161_v43, 4  ;;  %v185_v55 = vrot.slane %v183_v46, 4 }
  0x19   :  { %v97_v56 = vld [vmem:[#allocation2 + $0x30] sm:$0xf]  ;;  %v1746_v57 = vld [vmem:[#allocation2 + $0x34] sm:$0x1]  ;;  %v229_v58 = vunpack.c.l.b16 %v153_v53  ;;  %v175_v59 = vor.u32 %v174_v48, %v171_v45  ;;  %v188_v60 = vrot.slane %v186_v50, 5  ;;  %v194_v61 = vrot.slane %v192_v51, 5 }
  0x1a   :  { %v51_v62 = vld [vmem:[%s2063_s0 + $0xc] sm:$0x1]  ;;  %65 = vst.msk [vmem:[#allocation2] sm:$0xf] %vm64_vm0, %v48_v34  ;;  %v167_v63 = vsel %vm1726_vm4, %v162_v54, %v166_v37  ;;  %v98_v0 = vld [vmem:[#allocation2 + $0x38] sm:$0xf] }
  0x1b   :  { %v197_v1 = vshrl.u32 %v97_v56, 16  ;;  %v200_v2 = vshll.u32 %v97_v56, 16  ;;  %v206_v3 = vshll.u32 %v1746_v57, 16  ;;  %v230_v4 = vunpack.c.l.b16 %v167_v63  ;;  %67 = vst.msk [vmem:[#allocation2 + $0x4] sm:$0x1] %vm66_vm1, %v49_v47  ;;  %v1545_v42 = vld [vmem:[%s2065_s2 + $0x28] sm:$0xff] }
  0x1c   :  { %v176_v5 = vrot.slane %v175_v59, 4  ;;  %v189_v6 = vor.u32 %v188_v60, %v185_v55  ;;  %v211_v7 = vshrl.u32 %v98_v0, 16  ;;  %v214_v10 = vshll.u32 %v98_v0, 16  ;;  %68 = vst.msk [vmem:[#allocation2 + $0x8] sm:$0xf] %vm64_vm0, %v50_v52  ;;  %s1620_s1 = smov 8  }
  0x1d   :  { %v199_v8 = vrot.slane %v197_v1, 4  ;;  %v202_v9 = vrot.slane %v200_v2, 5  ;;  %v236_v11 = vpack.c.b16 %v230_v4, %v229_v58  ;;  %69 = vst.msk [vmem:[#allocation2 + $0xc] sm:$0x1] %vm66_vm1, %v51_v62  ;;  %v1760_v16 = vld [vmem:[#allocation2 + $0x10] sm:$0xf] }
  0x1e   :  { %v181_v12 = vsel %vm1726_vm4, %v176_v5, %v180_v49  ;;  %v190_v13 = vrot.slane %v189_v6, 4  ;;  %v213_v15 = vrot.slane %v211_v7, 4  ;;  %v208_v21 = vrot.slane %v206_v3, 5  ;;  %v1551_v1 = vld [vmem:[%s2065_s2 + $0x38] sm:$0xff] }
  0x1f   :  { %v231_v17 = vunpack.c.l.b16 %v181_v12  ;;  %v1762_v18 = vld [vmem:[#allocation2 + $0x3c] sm:$0x1]  ;;  %v203_v19 = vor.u32 %v202_v9, %v199_v8  ;;  %v216_v22 = vrot.slane %v214_v10, 5  ;;  %1379 = vmatmul.msk.bf16.vlgmr.msra.gmra.mxu1 %vm245_vm5, %v236_v11  ;;  %v601_v35 = vshrl.u32 %v1760_v16, 16 }
  0x20   :  { %v195_v23 = vsel %vm1726_vm4, %v190_v13, %v194_v61  ;;  %v220_v24 = vshll.u32 %v1762_v18, 16  ;;  %864 = vmatpush.bf16.msra.mxu1 %v1545_v42  ;;  %v604_v0 = vshll.u32 %v1760_v16, 16 }
  0x21   :  { %v232_v25 = vunpack.c.l.b16 %v195_v23  ;;  %v204_v26 = vrot.slane %v203_v19, 4  ;;  %v217_v27 = vor.u32 %v216_v22, %v213_v15  ;;  %v91_v28 = vld [vmem:[#allocation2] sm:$0xf]  ;;  %v603_v10 = vrot.slane %v601_v35, 4  ;;  %v1797_v19 = vld [vmem:[#allocation2 + $0x14] sm:$0x1] }
  0x22   :  { %v222_v30 = vrot.slane %v220_v24, 5  ;;  %v113_v31 = vshrl.u32 %v91_v28, 16  ;;  %v116_v33 = vshll.u32 %v91_v28, 16  ;;  %v354_v34 = vld [vmem:[#allocation2] sm:$0xe] }
  0x23   :  { %v237_v37 = vpack.c.b16 %v232_v25, %v231_v17  ;;  %v209_v38 = vsel %vm1726_vm4, %v204_v26, %v208_v21  ;;  %v218_v39 = vrot.slane %v217_v27, 4  ;;  %v101_v40 = vld [vmem:[#allocation2 + $0x4] sm:$0x1]  ;;  %v1406_v41 = vrot.slane %v354_v34, 9  ;;  %v92_v45 = vld [vmem:[#allocation2 + $0x8] sm:$0xf] }
  0x24   :  { %v233_v43 = vunpack.c.l.b16 %v209_v38  ;;  %v115_v46 = vrot.slane %v113_v31, 4  ;;  %v118_v47 = vrot.slane %v116_v33, 5  ;;  %v122_v48 = vshll.u32 %v101_v40, 16  ;;  %v102_v50 = vld [vmem:[#allocation2 + $0xc] sm:$0x1] }
  0x25   :  { %1380 = vmatmul.msk.bf16.vlgmr.msra.gmra.mxu2 %vm245_vm5, %v237_v37  ;;  %v223_v49 = vsel %vm1726_vm4, %v218_v39, %v222_v30  ;;  %v127_v51 = vshrl.u32 %v92_v45, 16  ;;  %v130_v52 = vshll.u32 %v92_v45, 16  ;;  %v383_v53 = vrot.slane %v101_v40, 5  ;;  %v355_v59 = vld [vmem:[#allocation2 + $0x8] sm:$0xe]  ;;  %v1552_v37 = vld [vmem:[%s2065_s2 + $0x40] sm:$0xff] }
  0x26   :  { %v234_v54 = vunpack.c.l.b16 %v223_v49  ;;  %v119_v55 = vor.u32 %v118_v47, %v115_v46  ;;  %v124_v56 = vrot.slane %v122_v48, 5  ;;  %v136_v58 = vshll.u32 %v102_v50, 16  ;;  %951 = vmatpush.bf16.msra.mxu2 %v1550_v29  ;;  %v1384_v4 = vld [vmem:[#allocation2] sm:$0xf]  ;;  %v570_v5 = vld [vmem:[#allocation2 + $0x8] sm:$0xf] }
  0x27   :  { %v129_v60 = vrot.slane %v127_v51, 4  ;;  %v132_v61 = vrot.slane %v130_v52, 5  ;;  %v387_v62 = vrot.slane %v102_v50, 5  ;;  %v1532_v8 = vld [vmem:[#allocation2 + $0x4] sm:$0xf0]  ;;  %v1407_v9 = vrot.slane %v355_v59, 9 }
  0x28   :  { %v238_v2 = vpack.c.b16 %v234_v54, %v233_v43  ;;  %v120_v3 = vrot.slane %v119_v55, 4  ;;  %v138_v7 = vrot.slane %v136_v58, 5  ;;  %v384_v12 = vsel %vm1782_vm8, %v1406_v41, %v383_v53  ;;  %v1799_v24 = vld [vmem:[#allocation2 + $0xc] sm:$0x1]  ;;  %v1539_v40 = vld [vmem:[#allocation2 + $0xc] sm:$0xf0] }
  0x29   :  { %v133_v6 = vor.u32 %v132_v61, %v129_v60  ;;  %v587_v13 = vshrl.u32 %v570_v5, 16  ;;  %v590_v15 = vshll.u32 %v570_v5, 16  ;;  %v388_v17 = vsel %vm1782_vm8, %v1407_v9, %v387_v62  ;;  %v1428_v41 = vld [vmem:[#allocation2 + $0x8] sm:$0xf]  ;;  %v356_v45 = vld [vmem:[#allocation2 + $0x10] sm:$0xe] }
  0x2a   :  { %1381 = vmatmul.msk.bf16.vlgmr.msra.gmra.mxu3 %vm245_vm5, %v238_v2  ;;  %v125_v11 = vsel %vm1726_vm4, %v120_v3, %v124_v56  ;;  %v606_v21 = vrot.slane %v604_v0, 5  ;;  %v1385_v23 = vor.u32 %v1532_v8, %v1384_v4  ;;  %v416_v28 = vunpack.c.l.b16 %v384_v12  ;;  %v357_v48 = vld [vmem:[#allocation2 + $0x18] sm:$0xe]  ;;  %v576_v50 = vld [vmem:[#allocation2 + $0x20] sm:$0xf] }
  0x2b   :  { %v134_v16 = vrot.slane %v133_v6, 4  ;;  %1149 = vmatpush.bf16.msra.mxu3 %v1551_v1  ;;  %v227_v22 = vunpack.c.l.b16 %v125_v11  ;;  %v589_v25 = vrot.slane %v587_v13, 4  ;;  %v592_v26 = vrot.slane %v590_v15, 5  ;;  %v574_v49 = vld [vmem:[#allocation2 + $0x18] sm:$0xf] }
  0x2c   :  { %v417_v29 = vunpack.c.l.b16 %v388_v17  ;;  %v607_v31 = vor.u32 %v606_v21, %v603_v10  ;;  %v610_v33 = vshll.u32 %v1797_v19, 16  ;;  %v596_v35 = vshll.u32 %v1799_v24, 16  ;;  %v1388_v0 = vld [vmem:[#allocation2 + $0x10] sm:$0xf]  ;;  %v1533_v1 = vld [vmem:[#allocation2 + $0x14] sm:$0xf0] }
  0x2d   :  { %v139_v27 = vsel %vm1726_vm4, %v134_v16, %v138_v7  ;;  %v593_v34 = vor.u32 %v592_v26, %v589_v25  ;;  %v1429_v51 = vor.u32 %v1539_v40, %v1428_v41  ;;  %v1408_v52 = vrot.slane %v356_v45, 9  ;;  %v1822_v9 = vld [vmem:[#allocation2 + $0x1c] sm:$0x1]  ;;  %v1824_v10 = vld [vmem:[#allocation2 + $0x24] sm:$0x1] }
  0x2e   :  { %v228_v30 = vunpack.c.l.b16 %v139_v27  ;;  %v424_v39 = vpack.c.b16 %v417_v29, %v416_v28  ;;  %v608_v42 = vrot.slane %v607_v31, 4  ;;  %v612_v43 = vrot.slane %v610_v33, 5  ;;  %v82_v11 = vld [vmem:[#allocation4] sm:$0xf]  ;;  %v1432_v26 = vld [vmem:[#allocation2 + $0x18] sm:$0xf] }
  0x2f   :  { %1402 = vmatmul.msk.bf16.vlgmr.msrb.gmra.mxu1 %vm245_vm5, %v1385_v23  ;;  %v594_v46 = vrot.slane %v593_v34, 4  ;;  %v598_v47 = vrot.slane %v596_v35, 5  ;;  %v391_v53 = vrot.slane %v1701_v14, 5  ;;  %v1409_v55 = vrot.slane %v357_v48, 9  ;;  %87 = vst.msk [vmem:[#allocation2 + $0x40] sm:$0xf] %vm64_vm0, %v82_v11 }
  0x30   :  { %v235_v38 = vpack.c.b16 %v228_v30, %v227_v22  ;;  %v613_v54 = vsel %vm1726_vm4, %v608_v42, %v612_v43  ;;  %v395_v56 = vrot.slane %v1709_v20, 5  ;;  %v615_v58 = vshrl.u32 %v574_v49, 16  ;;  %v83_v23 = vld [vmem:[#allocation4 + $0x4] sm:$0x1]  ;;  %v578_v27 = vld [vmem:[#allocation2 + $0x28] sm:$0xf] }
  0x31   :  { %v599_v59 = vsel %vm1726_vm4, %v594_v46, %v598_v47  ;;  %v618_v60 = vshll.u32 %v574_v49, 16  ;;  %v629_v61 = vshrl.u32 %v576_v50, 16  ;;  %v632_v62 = vshll.u32 %v576_v50, 16  ;;  %88 = vst.msk [vmem:[#allocation2 + $0x44] sm:$0x1] %vm66_vm1, %v83_v23 }
  0x32   :  { %1378 = vmatmul.msk.bf16.vlgmr.msra.gmra.mxu0 %vm245_vm5, %v235_v38  ;;  %v701_v2 = vunpack.c.l.b16 %v599_v59  ;;  %v702_v3 = vunpack.c.l.b16 %v613_v54  ;;  %v392_v14 = vsel %vm1782_vm8, %v1408_v52, %v391_v53  ;;  %v396_v4 = vsel %vm1782_vm8, %v1409_v55, %v395_v56  ;;  %v1540_v28 = vld [vmem:[#allocation2 + $0x1c] sm:$0xf0]  ;;  %v580_v30 = vld [vmem:[#allocation2 + $0x30] sm:$0xf]  ;;  %v1534_v53 = vld [vmem:[#allocation2 + $0x24] sm:$0xf0] }
  0x33   :  { %1275 = vmatpush.bf16.msra.mxu0 %v1552_v37  ;;  %v617_v20 = vrot.slane %v615_v58, 4  ;;  %v620_v5 = vrot.slane %v618_v60, 5  ;;  %v631_v6 = vrot.slane %v629_v61, 4  ;;  %v634_v7 = vrot.slane %v632_v62, 5  ;;  %v358_v29 = vld [vmem:[#allocation2 + $0x20] sm:$0xe] }
  0x34   :  { %v1389_v8 = vor.u32 %v1533_v1, %v1388_v0  ;;  %v418_v12 = vunpack.c.l.b16 %v392_v14  ;;  %v419_v13 = vunpack.c.l.b16 %v396_v4  ;;  %v709_v15 = vpack.c.b16 %v702_v3, %v701_v2  ;;  %v359_v37 = vld [vmem:[#allocation2 + $0x28] sm:$0xe]  ;;  %v1392_v50 = vld [vmem:[#allocation2 + $0x20] sm:$0xf]  ;;  %v1839_v54 = vld [vmem:[#allocation2 + $0x2c] sm:$0x1] }
  0x35   :  { %1420 = vmatmul.msk.bf16.vlgmr.msrb.gmra.mxu2 %vm245_vm5, %v424_v39  ;;  %v621_v16 = vor.u32 %v620_v5, %v617_v20  ;;  %v624_v17 = vshll.u32 %v1822_v9, 16  ;;  %v635_v21 = vor.u32 %v634_v7, %v631_v6  ;;  %v638_v22 = vshll.u32 %v1824_v10, 16  ;;  %v1846_v60 = vld [vmem:[#allocation2 + $0x34] sm:$0x1]  ;;  %v1436_v7 = vld [vmem:[#allocation2 + $0x28] sm:$0xf] }
  0x36   :  { %v425_v25 = vpack.c.b16 %v419_v13, %v418_v12  ;;  %v643_v38 = vshrl.u32 %v578_v27, 16  ;;  %v646_v39 = vshll.u32 %v578_v27, 16  ;;  %v1433_v40 = vor.u32 %v1540_v28, %v1432_v26  ;;  %v360_v13 = vld [vmem:[#allocation2 + $0x30] sm:$0xe] }
  0x37   :  { %v622_v31 = vrot.slane %v621_v16, 4  ;;  %v626_v33 = vrot.slane %v624_v17, 5  ;;  %v636_v34 = vrot.slane %v635_v21, 4  ;;  %v640_v35 = vrot.slane %v638_v22, 5  ;;  %v582_v16 = vld [vmem:[#allocation2 + $0x38] sm:$0xf] }
  0x38   :  { %v657_v41 = vshrl.u32 %v580_v30, 16  ;;  %v660_v42 = vshll.u32 %v580_v30, 16  ;;  %v1410_v43 = vrot.slane %v358_v29, 9  ;;  %v399_v45 = vrot.slane %v1716_v32, 5  ;;  %v584_v17 = vld [vmem:[#allocation2 + $0x40] sm:$0xf] }
  0x39   :  { %v1411_v46 = vrot.slane %v359_v37, 9  ;;  %v403_v47 = vrot.slane %v1734_v44, 5  ;;  %v627_v48 = vsel %vm1726_vm4, %v622_v31, %v626_v33  ;;  %v641_v49 = vsel %vm1726_vm4, %v636_v34, %v640_v35  ;;  %v1396_v37 = vld [vmem:[#allocation2 + $0x30] sm:$0xf] }
  0x3a   :  { %1446 = vmatmul.msk.bf16.vlgmr.msrb.gmra.mxu3 %vm245_vm5, %v1429_v51  ;;  %v645_v51 = vrot.slane %v643_v38, 4  ;;  %v648_v52 = vrot.slane %v646_v39, 5  ;;  %v659_v55 = vrot.slane %v657_v41, 4  ;;  %v662_v56 = vrot.slane %v660_v42, 5  ;;  %v1535_v38 = vld [vmem:[#allocation2 + $0x34] sm:$0xf0] }
  0x3b   :  { %v703_v32 = vunpack.c.l.b16 %v627_v48  ;;  %v704_v58 = vunpack.c.l.b16 %v641_v49  ;;  %v400_v44 = vsel %vm1782_vm8, %v1410_v43, %v399_v45  ;;  %v404_v59 = vsel %vm1782_vm8, %v1411_v46, %v403_v47  ;;  %v1864_v43 = vld [vmem:[#allocation2 + $0x3c] sm:$0x1]  ;;  %v1866_v45 = vld [vmem:[#allocation2 + $0x44] sm:$0x1]  ;;  %v981_v47 = vld [vmem:[#allocation2 + $0x10] sm:$0xf] }
  0x3c   :  { %v1393_v61 = vor.u32 %v1534_v53, %v1392_v50  ;;  %v649_v62 = vor.u32 %v648_v52, %v645_v51  ;;  %v652_v0 = vshll.u32 %v1839_v54, 16  ;;  %v420_v1 = vunpack.c.l.b16 %v400_v44  ;;  %v983_v48 = vld [vmem:[#allocation2 + $0x18] sm:$0xf] }
  0x3d   :  { %v421_v2 = vunpack.c.l.b16 %v404_v59  ;;  %v663_v3 = vor.u32 %v662_v56, %v659_v55  ;;  %v666_v14 = vshll.u32 %v1846_v60, 16  ;;  %v710_v4 = vpack.c.b16 %v704_v58, %v703_v32  ;;  %v768_v32 = vld [vmem:[#allocation2 + $0x8] sm:$0xe]  ;;  %v769_v58 = vld [vmem:[#allocation2 + $0x10] sm:$0xe] }
  0x3e   :  { %v650_v20 = vrot.slane %v649_v62, 4  ;;  %v654_v5 = vrot.slane %v652_v0, 5  ;;  %v407_v23 = vrot.slane %v1746_v57, 5  ;;  %v1412_v26 = vrot.slane %v360_v13, 9 }
  0x3f   :  { %1403 = vmatmul.msk.bf16.gmra.mxu1 %vm245_vm5, %v1389_v8  ;;  %v426_v6 = vpack.c.b16 %v421_v2, %v420_v1  ;;  %v1541_v8 = vld [vmem:[#allocation2 + $0x2c] sm:$0xf0]  ;;  %v664_v11 = vrot.slane %v663_v3, 4  ;;  %v668_v12 = vrot.slane %v666_v14, 5  ;;  %v411_v28 = vrot.slane %v1762_v18, 5 }
  0x40   :  { %v1437_v21 = vor.u32 %v1541_v8, %v1436_v7  ;;  %v655_v22 = vsel %vm1726_vm4, %v650_v20, %v654_v5  ;;  %v671_v29 = vshrl.u32 %v582_v16, 16  ;;  %v674_v30 = vshll.u32 %v582_v16, 16  ;;  %v1542_v8 = vld [vmem:[#allocation2 + $0x3c] sm:$0xf0]  ;;  %v984_v16 = vld [vmem:[#allocation2 + $0x1c] sm:$0x1] }
  0x41   :  { %v685_v31 = vshrl.u32 %v584_v17, 16  ;;  %v688_v33 = vshll.u32 %v584_v17, 16  ;;  %v705_v34 = vunpack.c.l.b16 %v655_v22  ;;  %v408_v57 = vsel %vm1782_vm8, %v1412_v26, %v407_v23 }
  0x42   :  { %1456 = vmatmul.msk.bf16.vlgmr.msrb.gmra.mxu0 %vm245_vm5, %v709_v15  ;;  %v361_v15 = vld [vmem:[#allocation2 + $0x38] sm:$0xe]  ;;  %v676_v41 = vrot.slane %v674_v30, 5  ;;  %v1397_v46 = vor.u32 %v1535_v38, %v1396_v37  ;;  %v422_v50 = vunpack.c.l.b16 %v408_v57  ;;  %v680_v53 = vshll.u32 %v1864_v43, 16  ;;  %v985_v37 = vld [vmem:[#allocation2 + $0x20] sm:$0xf] }
  0x43   :  { %v1413_v27 = vrot.slane %v361_v15, 9  ;;  %v687_v42 = vrot.slane %v685_v31, 4  ;;  %v690_v18 = vrot.slane %v688_v33, 5  ;;  %v694_v56 = vshll.u32 %v1866_v45, 16  ;;  %v1482_v31 = vld [vmem:[#allocation2 + $0x10] sm:$0xf] }
  0x44   :  { %v998_v44 = vshrl.u32 %v981_v47, 16  ;;  %v1001_v59 = vshll.u32 %v981_v47, 16  ;;  %v1015_v62 = vshll.u32 %v983_v48, 16  ;;  %v794_v0 = vrot.slane %v1799_v24, 5  ;;  %v982_v24 = vld [vmem:[#allocation2 + $0x14] sm:$0x1] }
  0x45   :  { %1421 = vmatmul.msk.bf16.gmra.mxu2 %vm245_vm5, %v425_v25  ;;  %v669_v25 = vsel %vm1726_vm4, %v664_v11, %v668_v12  ;;  %v412_v39 = vsel %vm1782_vm8, %v1413_v27, %v411_v28  ;;  %v691_v55 = vor.u32 %v690_v18, %v687_v42  ;;  %v798_v1 = vrot.slane %v1797_v19, 5  ;;  %v987_v38 = vld [vmem:[#allocation2 + $0x28] sm:$0xf]  ;;  %v1179_v42 = vld [vmem:[#allocation2 + $0x10] sm:$0xe] }
  0x46   :  { %v706_v35 = vunpack.c.l.b16 %v669_v25  ;;  %v423_v51 = vunpack.c.l.b16 %v412_v39  ;;  %v1460_v3 = vrot.slane %v768_v32, 9  ;;  %v1461_v14 = vrot.slane %v769_v58, 9  ;;  %v770_v47 = vld [vmem:[#allocation2 + $0x18] sm:$0xe] }
  0x47   :  { %v682_v5 = vrot.slane %v680_v53, 5  ;;  %v696_v7 = vrot.slane %v694_v56, 5  ;;  %v1000_v11 = vrot.slane %v998_v44, 4  ;;  %v1003_v12 = vrot.slane %v1001_v59, 5 }
  0x48   :  { %v711_v49 = vpack.c.b16 %v706_v35, %v705_v34  ;;  %v427_v2 = vpack.c.b16 %v423_v51, %v422_v50  ;;  %v1017_v15 = vrot.slane %v1015_v62, 5  ;;  %v795_v19 = vsel %vm1782_vm8, %v1460_v3, %v794_v0  ;;  %v1546_v35 = vld [vmem:[#allocation2 + $0x14] sm:$0xf0] }
  0x49   :  { %v799_v17 = vsel %vm1782_vm8, %v1461_v14, %v798_v1  ;;  %v1004_v25 = vor.u32 %v1003_v12, %v1000_v11  ;;  %v1007_v26 = vshll.u32 %v982_v24, 16  ;;  %v1021_v28 = vshll.u32 %v984_v16, 16 }
  0x4a   :  { %1447 = vmatmul.msk.bf16.gmra.mxu3 %vm245_vm5, %v1433_v40  ;;  %v673_v40 = vrot.slane %v671_v29, 4  ;;  %v827_v29 = vunpack.c.l.b16 %v795_v19  ;;  %v828_v30 = vunpack.c.l.b16 %v799_v17  ;;  %v1029_v50 = vshll.u32 %v985_v37, 16 }
  0x4b   :  { %v1005_v57 = vrot.slane %v1004_v25, 4  ;;  %v1009_v39 = vrot.slane %v1007_v26, 5  ;;  %v1040_v51 = vshrl.u32 %v987_v38, 16  ;;  %v1514_v56 = vrot.slane %v1179_v42, 9  ;;  %v773_v42 = vld [vmem:[#allocation2 + $0x30] sm:$0xe] }
  0x4c   :  { %v677_v52 = vor.u32 %v676_v41, %v673_v40  ;;  %v1023_v41 = vrot.slane %v1021_v28, 5  ;;  %v835_v18 = vpack.c.b16 %v828_v30, %v827_v29  ;;  %v1205_v32 = vrot.slane %v982_v24, 5  ;;  %v1486_v29 = vld [vmem:[#allocation2 + $0x20] sm:$0xf]  ;;  %v989_v30 = vld [vmem:[#allocation2 + $0x30] sm:$0xf] }
  0x4d   :  { %v1010_v58 = vsel %vm1726_vm4, %v1005_v57, %v1009_v39  ;;  %v1462_v62 = vrot.slane %v770_v47, 9  ;;  %v802_v0 = vrot.slane %v1822_v9, 5  ;;  %v1031_v14 = vrot.slane %v1029_v50, 5 }
  0x4e   :  { %v678_v20 = vrot.slane %v677_v52, 4  ;;  %v1043_v52 = vshll.u32 %v987_v38, 16  ;;  %v1206_v11 = vsel %vm1782_vm8, %v1514_v56, %v1205_v32 }
  0x4f   :  { %1404 = vmatmul.msk.bf16.gmra.mxu1 %vm245_vm5, %v1393_v61  ;;  %v1012_v61 = vshrl.u32 %v983_v48, 16  ;;  %v771_v48 = vld [vmem:[#allocation2 + $0x20] sm:$0xe]  ;;  %v1238_v17 = vunpack.c.l.b16 %v1206_v11 }
  0x50   :  { %v683_v22 = vsel %vm1726_vm4, %v678_v20, %v682_v5  ;;  %v1463_v1 = vrot.slane %v771_v48, 9  ;;  %v1045_v20 = vrot.slane %v1043_v52, 5  ;;  %v1112_v5 = vunpack.c.l.b16 %v1010_v58 }
  0x51   :  { %v1014_v13 = vrot.slane %v1012_v61, 4  ;;  %v707_v33 = vunpack.c.l.b16 %v683_v22  ;;  %v1209_v61 = vrot.slane %v984_v16, 5 }
  0x52   :  { %1457 = vmatmul.msk.bf16.gmra.mxu0 %vm245_vm5, %v710_v4  ;;  %v1440_v4 = vld [vmem:[#allocation2 + $0x38] sm:$0xf] }
  0x53   :  { %v1018_v27 = vor.u32 %v1017_v15, %v1014_v13 }
  0x55   :  { %1422 = vmatmul.msk.bf16.gmra.mxu2 %vm245_vm5, %v426_v6  ;;  %v692_v6 = vrot.slane %v691_v55, 4  ;;  %v1019_v40 = vrot.slane %v1018_v27, 4  ;;  %v1483_v55 = vor.u32 %v1546_v35, %v1482_v31  ;;  %v991_v31 = vld [vmem:[#allocation2 + $0x38] sm:$0xf]  ;;  %v1547_v35 = vld [vmem:[#allocation2 + $0x24] sm:$0xf0] }
  0x56   :  { %v1068_v47 = vshrl.u32 %v991_v31, 16  ;;  %v1071_v48 = vshll.u32 %v991_v31, 16  ;;  %v1487_v50 = vor.u32 %v1547_v35, %v1486_v29  ;;  %v1183_v29 = vld [vmem:[#allocation2 + $0x30] sm:$0xe]  ;;  %v775_v31 = vld [vmem:[#allocation2 + $0x40] sm:$0xe] }
  0x57   :  { %v697_v23 = vsel %vm1726_vm4, %v692_v6, %v696_v7  ;;  %v1024_v44 = vsel %vm1726_vm4, %v1019_v40, %v1023_v41  ;;  %v986_v7 = vld [vmem:[#allocation2 + $0x24] sm:$0x1]  ;;  %v1182_v40 = vld [vmem:[#allocation2 + $0x28] sm:$0xe] }
  0x58   :  { %v708_v34 = vunpack.c.l.b16 %v697_v23  ;;  %v1113_v6 = vunpack.c.l.b16 %v1024_v44  ;;  %v1035_v15 = vshll.u32 %v986_v7, 16  ;;  %v772_v41 = vld [vmem:[#allocation2 + $0x28] sm:$0xe]  ;;  %v1517_v32 = vrot.slane %v1182_v40, 9 }
  0x59   :  { %v1464_v58 = vrot.slane %v772_v41, 9  ;;  %v810_v44 = vrot.slane %v1839_v54, 5 }
  0x5a   :  { %1448 = vmatmul.msk.bf16.gmra.mxu3 %vm245_vm5, %v1437_v21  ;;  %v1441_v21 = vor.u32 %v1542_v8, %v1440_v4  ;;  %v712_v53 = vpack.c.b16 %v708_v34, %v707_v33  ;;  %v1042_v4 = vrot.slane %v1040_v51, 4  ;;  %v1892_v8 = vld [vmem:[#allocation2 + $0x2c] sm:$0x1]  ;;  %v1120_v19 = vpack.c.b16 %v1113_v6, %v1112_v5  ;;  %v84_v33 = vld [vmem:[#allocation4 + $0x8] sm:$0xf] }
  0x5b   :  { %v1049_v16 = vshll.u32 %v1892_v8, 16  ;;  %v1037_v26 = vrot.slane %v1035_v15, 5  ;;  %89 = vst.msk [vmem:[#allocation2 + $0x48] sm:$0xf] %vm64_vm0, %v84_v33  ;;  %v1213_v51 = vrot.slane %v986_v7, 5  ;;  %v1217_v52 = vrot.slane %v1892_v8, 5 }
  0x5c   :  { %v1046_v24 = vor.u32 %v1045_v20, %v1042_v4  ;;  %v1184_v33 = vld [vmem:[#allocation2 + $0x38] sm:$0xe] }
  0x5d   :  { %v1051_v28 = vrot.slane %v1049_v16, 5  ;;  %v1218_v54 = vsel %vm1782_vm8, %v1517_v32, %v1217_v52 }
  0x5e   :  { %v1047_v27 = vrot.slane %v1046_v24, 4 }
  0x5f   :  { %1405 = vmatmul.msk.bf16.gmra.mxu1 %vm245_vm5, %v1397_v46  ;;  %v1180_v46 = vld [vmem:[#allocation2 + $0x18] sm:$0xe] }
  0x60   :  { %v1515_v59 = vrot.slane %v1180_v46, 9  ;;  %v1052_v39 = vsel %vm1726_vm4, %v1047_v27, %v1051_v28  ;;  %v1057_v46 = vshll.u32 %v989_v30, 16 }
  0x62   :  { %1458 = vmatmul.msk.bf16.gmra.mxu0 %vm245_vm5, %v711_v49  ;;  %v1026_v49 = vshrl.u32 %v985_v37, 16  ;;  %v1210_v9 = vsel %vm1782_vm8, %v1515_v59, %v1209_v61  ;;  %v1181_v37 = vld [vmem:[#allocation2 + $0x20] sm:$0xe]  ;;  %v1465_v59 = vrot.slane %v773_v42, 9  ;;  %v814_v61 = vrot.slane %v1846_v60, 5 }
  0x63   :  { %v1516_v56 = vrot.slane %v1181_v37, 9  ;;  %v811_v60 = vsel %vm1782_vm8, %v1464_v58, %v810_v44  ;;  %v818_v42 = vrot.slane %v1864_v43, 5 }
  0x64   :  { %v1028_v3 = vrot.slane %v1026_v49, 4  ;;  %v85_v49 = vld [vmem:[#allocation4 + $0xc] sm:$0x1]  ;;  %v815_v5 = vsel %vm1782_vm8, %v1465_v59, %v814_v61 }
  0x65   :  { %1423 = vmatmul.msk.bf16.gmra.mxu2 %vm245_vm5, %v427_v2  ;;  %v806_v2 = vrot.slane %v1824_v10, 5  ;;  %v803_v10 = vsel %vm1782_vm8, %v1462_v62, %v802_v0  ;;  %90 = vst.msk [vmem:[#allocation2 + $0x4c] sm:$0x1] %vm66_vm1, %v85_v49  ;;  %v1059_v0 = vrot.slane %v1057_v46, 5  ;;  %v1214_v4 = vsel %vm1782_vm8, %v1516_v56, %v1213_v51  ;;  %v994_v56 = vld [vmem:[#allocation2 + $0x44] sm:$0x1] }
  0x66   :  { %v1032_v13 = vor.u32 %v1031_v14, %v1028_v3  ;;  %v829_v22 = vunpack.c.l.b16 %v803_v10  ;;  %v990_v3 = vld [vmem:[#allocation2 + $0x34] sm:$0x1]  ;;  %v992_v14 = vld [vmem:[#allocation2 + $0x3c] sm:$0x1]  ;;  %v832_v10 = vunpack.c.l.b16 %v815_v5  ;;  %v822_v46 = vrot.slane %v1866_v45, 5 }
  0x67   :  { %v807_v12 = vsel %vm1782_vm8, %v1463_v1, %v806_v2  ;;  %v1070_v1 = vrot.slane %v1068_v47, 4  ;;  %v1073_v2 = vrot.slane %v1071_v48, 5  ;;  %v1063_v7 = vshll.u32 %v990_v3, 16 }
  0x68   :  { %v830_v23 = vunpack.c.l.b16 %v807_v12  ;;  %v1033_v25 = vrot.slane %v1032_v13, 4  ;;  %v1077_v11 = vshll.u32 %v992_v14, 16  ;;  %v1240_v12 = vunpack.c.l.b16 %v1214_v4 }
  0x69   :  { %v1074_v8 = vor.u32 %v1073_v2, %v1070_v1  ;;  %v1241_v13 = vunpack.c.l.b16 %v1218_v54  ;;  %v1065_v24 = vrot.slane %v1063_v7, 5  ;;  %v1225_v40 = vrot.slane %v992_v14, 5 }
  0x6a   :  { %1449 = vmatmul.msk.bf16.gmra.mxu3 %vm245_vm5, %v1441_v21  ;;  %v1239_v21 = vunpack.c.l.b16 %v1210_v9  ;;  %v836_v34 = vpack.c.b16 %v830_v23, %v829_v22  ;;  %v1038_v57 = vsel %vm1726_vm4, %v1033_v25, %v1037_v26  ;;  %v831_v9 = vunpack.c.l.b16 %v811_v60  ;;  %v995_v22 = vld [vmem:[#allocation2 + $0x48] sm:$0xf]  ;;  %v1490_v23 = vld [vmem:[#allocation2 + $0x30] sm:$0xf]  ;;  %v1548_v25 = vld [vmem:[#allocation2 + $0x34] sm:$0xf0] }
  0x6b   :  { %v1075_v16 = vrot.slane %v1074_v8, 4  ;;  %v1247_v26 = vpack.c.b16 %v1241_v13, %v1240_v12  ;;  %v1096_v37 = vshrl.u32 %v995_v22, 16  ;;  %v1518_v49 = vrot.slane %v1183_v29, 9  ;;  %v1185_v13 = vld [vmem:[#allocation2 + $0x40] sm:$0xe] }
  0x6c   :  { %v1246_v38 = vpack.c.b16 %v1239_v21, %v1238_v17  ;;  %v837_v17 = vpack.c.b16 %v832_v10, %v831_v9  ;;  %v993_v21 = vld [vmem:[#allocation2 + $0x40] sm:$0xf]  ;;  %v996_v32 = vld [vmem:[#allocation2 + $0x4c] sm:$0x1]  ;;  %v1549_v9 = vld [vmem:[#allocation2 + $0x44] sm:$0xf0] }
  0x6d   :  { %v1085_v35 = vshll.u32 %v993_v21, 16  ;;  %v1105_v1 = vshll.u32 %v996_v32, 16 }
  0x6f   :  { %1474 = vmatmul.msk.bf16.vlgmr.msra.gmra.mxu1 %vm245_vm5, %v835_v18  ;;  %v1054_v18 = vshrl.u32 %v989_v30, 16  ;;  %v774_v30 = vld [vmem:[#allocation2 + $0x38] sm:$0xe]  ;;  %v1087_v52 = vrot.slane %v1085_v35, 5  ;;  %v1107_v5 = vrot.slane %v1105_v1, 5 }
  0x70   :  { %v1466_v41 = vrot.slane %v774_v30, 9 }
  0x71   :  { %v1056_v62 = vrot.slane %v1054_v18, 4  ;;  %v1467_v18 = vrot.slane %v775_v31, 9 }
  0x72   :  { %1459 = vmatmul.msk.bf16.gmra.mxu0 %vm245_vm5, %v712_v53  ;;  %v1114_v53 = vunpack.c.l.b16 %v1038_v57  ;;  %v1491_v57 = vor.u32 %v1548_v25, %v1490_v23  ;;  %v819_v43 = vsel %vm1782_vm8, %v1466_v41, %v818_v42  ;;  %v1233_v23 = vrot.slane %v996_v32, 5 }
  0x73   :  { %v1060_v6 = vor.u32 %v1059_v0, %v1056_v62  ;;  %v823_v45 = vsel %vm1782_vm8, %v1467_v18, %v822_v46  ;;  %v1091_v62 = vshll.u32 %v994_v56, 16  ;;  %v833_v2 = vunpack.c.l.b16 %v819_v43 }
  0x75   :  { %1500 = vmatmul.msk.bf16.vlgmr.msra.gmra.mxu2 %vm245_vm5, %v1483_v55  ;;  %v1115_v55 = vunpack.c.l.b16 %v1052_v39  ;;  %v1061_v15 = vrot.slane %v1060_v6, 4  ;;  %v1221_v39 = vrot.slane %v990_v3, 5  ;;  %v834_v3 = vunpack.c.l.b16 %v823_v45 }
  0x76   :  { %v1093_v54 = vrot.slane %v1091_v62, 5 }
  0x77   :  { %v1121_v20 = vpack.c.b16 %v1115_v55, %v1114_v53  ;;  %v1066_v27 = vsel %vm1726_vm4, %v1061_v15, %v1065_v24  ;;  %v1098_v53 = vrot.slane %v1096_v37, 4  ;;  %v1222_v44 = vsel %vm1782_vm8, %v1518_v49, %v1221_v39  ;;  %v1186_v15 = vld [vmem:[#allocation2 + $0x48] sm:$0xe] }
  0x78   :  { %v1116_v47 = vunpack.c.l.b16 %v1066_v27  ;;  %v1242_v14 = vunpack.c.l.b16 %v1222_v44  ;;  %v838_v6 = vpack.c.b16 %v834_v3, %v833_v2 }
  0x7a   :  { %1510 = vmatmul.msk.bf16.vlgmr.msra.gmra.mxu3 %vm245_vm5, %v1120_v19  ;;  %v1079_v19 = vrot.slane %v1077_v11, 5  ;;  %v1494_v11 = vld [vmem:[#allocation2 + $0x40] sm:$0xf] }
  0x7b   :  { %v1495_v24 = vor.u32 %v1549_v9, %v1494_v11 }
  0x7c   :  { %v1080_v28 = vsel %vm1726_vm4, %v1075_v16, %v1079_v19 }
  0x7d   :  { %v1117_v48 = vunpack.c.l.b16 %v1080_v28 }
  0x7f   :  { %1475 = vmatmul.msk.bf16.gmra.mxu1 %vm245_vm5, %v836_v34  ;;  %v1082_v34 = vshrl.u32 %v993_v21, 16  ;;  %v1122_v58 = vpack.c.b16 %v1117_v48, %v1116_v47  ;;  %v1229_v21 = vrot.slane %v994_v56, 5 }
  0x81   :  { %v1084_v51 = vrot.slane %v1082_v34, 4 }
  0x82   :  { %1528 = vmatmul.msk.bf16.vlgmr.msra.gmra.mxu0 %vm245_vm5, %v1246_v38  ;;  %v1099_v38 = vshll.u32 %v995_v22, 16  ;;  %v1521_v22 = vrot.slane %v1186_v15, 9 }
  0x83   :  { %v1088_v61 = vor.u32 %v1087_v52, %v1084_v51 }
  0x84   :  { %v1101_v55 = vrot.slane %v1099_v38, 5  ;;  %v1234_v27 = vsel %vm1782_vm8, %v1521_v22, %v1233_v23  ;;  %v2007_v23 = vld [vmem:[%s2066_s3] ss:$0 sm:$0xff]  ;;  %s1618_s3 = smov [#allocation7]  }
  0x85   :  { %1501 = vmatmul.msk.bf16.gmra.mxu2 %vm245_vm5, %v1487_v50  ;;  %v1519_v50 = vrot.slane %v1184_v33, 9  ;;  %v1245_v30 = vunpack.c.l.b16 %v1234_v27 }
  0x86   :  { %v1102_v0 = vor.u32 %v1101_v55, %v1098_v53 }
  0x87   :  { %v1226_v59 = vsel %vm1782_vm8, %v1519_v50, %v1225_v40 }
  0x88   :  { %v1243_v4 = vunpack.c.l.b16 %v1226_v59  ;;  %v1103_v60 = vrot.slane %v1102_v0, 4 }
  0x8a   :  { %1511 = vmatmul.msk.bf16.gmra.mxu3 %vm245_vm5, %v1121_v20  ;;  %v1089_v20 = vrot.slane %v1088_v61, 4  ;;  %v1248_v8 = vpack.c.b16 %v1243_v4, %v1242_v14  ;;  %v1108_v12 = vsel %vm1726_vm4, %v1103_v60, %v1107_v5 }
  0x8b   :  { %v1119_v19 = vunpack.c.l.b16 %v1108_v12 }
  0x8c   :  { %v1094_v10 = vsel %vm1726_vm4, %v1089_v20, %v1093_v54 }
  0x8d   :  { %v1118_v16 = vunpack.c.l.b16 %v1094_v10 }
  0x8f   :  { %1476 = vmatmul.msk.bf16.gmra.mxu1 %vm245_vm5, %v837_v17  ;;  %v1520_v17 = vrot.slane %v1185_v13, 9 }
  0x91   :  { %v1230_v36 = vsel %vm1782_vm8, %v1520_v17, %v1229_v21 }
  0x92   :  { %1529 = vmatmul.msk.bf16.gmra.mxu0 %vm245_vm5, %v1247_v26  ;;  %v1123_v26 = vpack.c.b16 %v1119_v19, %v1118_v16  ;;  %v1244_v29 = vunpack.c.l.b16 %v1230_v36 }
  0x94   :  { %v1249_v34 = vpack.c.b16 %v1245_v30, %v1244_v29 }
  0x95   :  { %1502 = vmatmul.msk.bf16.gmra.mxu2 %vm245_vm5, %v1491_v57 }
  0x9a   :  { %1512 = vmatmul.msk.bf16.gmra.mxu3 %vm245_vm5, %v1122_v58 }
  0x9c   :  { %v1944_v7 = vpop.f32.mrf.mxu1 }
  0x9f   :  { %1477 = vmatmul.msk.bf16.gmra.mxu1 %vm245_vm5, %v838_v6 }
  0xa2   :  { %1530 = vmatmul.msk.bf16.gmra.mxu0 %vm245_vm5, %v1248_v8 }
  0xa4   :  { %v1953_v25 = vpop.f32.mrf.mxu1 }
  0xa5   :  { %1503 = vmatmul.msk.bf16.gmra.mxu2 %vm245_vm5, %v1495_v24 }
  0xa8   :  { %v1959_v28 = vpop.f32.mrf.mxu2 }
  0xaa   :  { %1513 = vmatmul.msk.bf16.gmra.mxu3 %vm245_vm5, %v1123_v26 }
  0xac   :  { %v334_v33 = vpop.f32.mrf.mxu1 }
  0xad   :  { %v1962_v31 = vpop.f32.mrf.mxu3 }
  0xaf   :  { %v267_v35 = vpop.f32.mrf.mxu0 }
  0xb0   :  { %v1964_v37 = vpop.f32.mrf.mxu2  ;;  %v335_v2 = vadd.f32 %v334_v33, %v267_v35  ;;  %v2012_v33 = vstv %s2067_s4  ;;  %s1356_s4 = sshll.u32 %s1618_s3, 4  ;;  %s1357_s4 = int_to_ptr.vmem [resolvable:$true] %s1356_s4 }
  0xb2   :  { %1531 = vmatmul.msk.bf16.gmra.mxu0 %vm245_vm5, %v1249_v34 }
  0xb4   :  { %v336_v57 = vpop.f32.mrf.mxu1 }
  0xb5   :  { %v1967_v38 = vpop.f32.mrf.mxu3 }
  0xb7   :  { %v269_v63 = vpop.f32.mrf.mxu0 }
  0xb8   :  { %v455_v39 = vpop.f32.mrf.mxu2  ;;  %v337_v5 = vadd.f32 %v336_v57, %v269_v63 }
  0xb9   :  { %v475_v4 = vadd.f32 %v455_v39, %v335_v2 }
  0xbc   :  { %v339_v41 = vpop.f32.mrf.mxu1 }
  0xbd   :  { %v542_v40 = vpop.f32.mrf.mxu3  ;;  %v340_v16 = vadd.f32 %v339_v41, %v1944_v7 }
  0xbe   :  { %v562_v60 = vadd.f32 %v542_v40, %v475_v4 }
  0xbf   :  { %v740_v42 = vpop.f32.mrf.mxu0 }
  0xc0   :  { %v457_v18 = vpop.f32.mrf.mxu2  ;;  %v760_v9 = vadd.f32 %v740_v42, %v562_v60 }
  0xc1   :  { %v476_v11 = vadd.f32 %v457_v18, %v337_v5 }
  0xc4   :  { %v341_v47 = vpop.f32.mrf.mxu1 }
  0xc5   :  { %v544_v46 = vpop.f32.mrf.mxu3  ;;  %v342_v57 = vadd.f32 %v341_v47, %v1953_v25 }
  0xc6   :  { %v563_v15 = vadd.f32 %v544_v46, %v476_v11 }
  0xc7   :  { %v742_v48 = vpop.f32.mrf.mxu0 }
  0xc8   :  { %v460_v49 = vpop.f32.mrf.mxu2  ;;  %v761_v26 = vadd.f32 %v742_v48, %v563_v15 }
  0xc9   :  { %v477_v21 = vadd.f32 %v460_v49, %v340_v16 }
  0xcc   :  { %v1969_v51 = vpop.f32.mrf.mxu1 }
  0xcd   :  { %v547_v50 = vpop.f32.mrf.mxu3  ;;  %v345_v47 = vadd.f32 %v1969_v51, %v1959_v28 }
  0xce   :  { %v564_v7 = vadd.f32 %v547_v50, %v477_v21 }
  0xcf   :  { %v745_v52 = vpop.f32.mrf.mxu0 }
  0xd0   :  { %v462_v53 = vpop.f32.mrf.mxu2  ;;  %v762_v46 = vadd.f32 %v745_v52, %v564_v7 }
  0xd1   :  { %v478_v41 = vadd.f32 %v462_v53, %v342_v57 }
  0xd4   :  { %v1971_v56 = vpop.f32.mrf.mxu1 }
  0xd5   :  { %v549_v55 = vpop.f32.mrf.mxu3  ;;  %v347_v16 = vadd.f32 %v1971_v56, %v1964_v37 }
  0xd7   :  { %v1973_v32 = vpop.f32.mrf.mxu0 }
  0xd8   :  { %v1975_v43 = vpop.f32.mrf.mxu2 }
  0xd9   :  { %v479_v5 = vadd.f32 %v1975_v43, %v345_v47 }
  0xdc   :  { %v1979_v58 = vpop.f32.mrf.mxu1 }
  0xdd   :  { %v1977_v45 = vpop.f32.mrf.mxu3  ;;  %v350_v7 = vadd.f32 %v1979_v58, %v1962_v31 }
  0xdf   :  { %v1981_v44 = vpop.f32.mrf.mxu0 }
  0xe0   :  { %v1983_v59 = vpop.f32.mrf.mxu2 }
  0xe4   :  { %v1987_v62 = vpop.f32.mrf.mxu1 }
  0xe5   :  { %v1985_v61 = vpop.f32.mrf.mxu3 }
  0xe7   :  { %v1989_v0 = vpop.f32.mrf.mxu0 }
  0xe8   :  { %v1991_v1 = vpop.f32.mrf.mxu2 }
  0xec   :  { %v866_v14 = vpop.f32.mrf.mxu1 }
  0xed   :  { %v1993_v3 = vpop.f32.mrf.mxu3  ;;  %v886_v12 = vadd.f32 %v866_v14, %v760_v9  ;;  %v565_v14 = vadd.f32 %v549_v55, %v478_v41 }
  0xef   :  { %v1995_v20 = vpop.f32.mrf.mxu0  ;;  %v763_v11 = vadd.f32 %v1973_v32, %v565_v14  ;;  %v480_v32 = vadd.f32 %v1983_v59, %v347_v16 }
  0xf0   :  { %v1997_v54 = vpop.f32.mrf.mxu2 }
  0xf4   :  { %v868_v8 = vpop.f32.mrf.mxu1 }
  0xf5   :  { %v1999_v6 = vpop.f32.mrf.mxu3  ;;  %v887_v29 = vadd.f32 %v868_v8, %v761_v26 }
  0xf7   :  { %v2001_v10 = vpop.f32.mrf.mxu0 }
  0xf8   :  { %v953_v13 = vpop.f32.mrf.mxu2 }
  0xf9   :  { %v973_v24 = vadd.f32 %v953_v13, %v886_v12 }
  0xfc   :  { %v871_v17 = vpop.f32.mrf.mxu1 }
  0xfd   :  { %v1151_v19 = vpop.f32.mrf.mxu3  ;;  %v888_v50 = vadd.f32 %v871_v17, %v762_v46  ;;  %v352_v46 = vadd.f32 %v1987_v62, %v1967_v38 }
  0xfe   :  { %v1171_v22 = vadd.f32 %v1151_v19, %v973_v24  ;;  %v566_v24 = vadd.f32 %v1977_v45, %v479_v5 }
  0xff   :  { %v1277_v36 = vpop.f32.mrf.mxu0 }
 0x100   :  { %v1297_v27 = vadd.f32 %v1277_v36, %v1171_v22  ;;  %v955_v30 = vpop.f32.mrf.mxu2  ;;  %v764_v22 = vadd.f32 %v1981_v44, %v566_v24  ;;  %v481_v44 = vadd.f32 %v1991_v1, %v350_v7 }
 0x101   :  { %v974_v35 = vadd.f32 %v955_v30, %v887_v29  ;;  %v567_v30 = vadd.f32 %v1985_v61, %v480_v32 }
 0x102   :  { %v1309_v34 = vadd.f32 %v2007_v23, %v1297_v27 }
 0x104   :  { %vm1318_vm9 = vcmp.ge.f32.partialorder %v1309_v34, 0.0  ;;  %v1327_v63 = vmul.f32 %v2012_v33, %v1309_v34  ;;  %v873_v40 = vpop.f32.mrf.mxu1 }
 0x105   :  { %v1153_v39 = vpop.f32.mrf.mxu3  ;;  %v889_v13 = vadd.f32 %v873_v40, %v763_v11 }
 0x106   :  { %v1335_v42 = vsel %vm1318_vm9, %v1309_v34, %v1327_v63  ;;  %v1172_v18 = vadd.f32 %v1153_v39, %v974_v35  ;;  %v765_v63 = vadd.f32 %v1989_v0, %v567_v30  ;;  %v482_v0 = vadd.f32 %v1997_v54, %v352_v46 }
 0x107   :  { %1344 = vst.msk [vmem:[#allocation7] sm:$0xff] %vm1343_vm10, %v1335_v42  ;;  %v1279_v48 = vpop.f32.mrf.mxu0  ;;  %v568_v42 = vadd.f32 %v1993_v3, %v481_v44 }
 0x108   :  { %v1298_v49 = vadd.f32 %v1279_v48, %v1172_v18  ;;  %v958_v2 = vpop.f32.mrf.mxu2  ;;  %v569_v47 = vadd.f32 %v1999_v6, %v482_v0 }
 0x109   :  { %v975_v25 = vadd.f32 %v958_v2, %v888_v50  ;;  %v766_v2 = vadd.f32 %v1995_v20, %v568_v42 }
 0x10a   :  { %v1310_v4 = vadd.f32 %v2007_v23, %v1298_v49  ;;  %v767_v20 = vadd.f32 %v2001_v10, %v569_v47 }
 0x10c   :  { %vm1319_vm11 = vcmp.ge.f32.partialorder %v1310_v4, 0.0  ;;  %v1328_v60 = vmul.f32 %v2012_v33, %v1310_v4  ;;  %v876_v55 = vpop.f32.mrf.mxu1 }
 0x10d   :  { %v1156_v53 = vpop.f32.mrf.mxu3  ;;  %v890_v36 = vadd.f32 %v876_v55, %v764_v22 }
 0x10e   :  { %v1336_v52 = vsel %vm1319_vm11, %v1310_v4, %v1328_v60  ;;  %v1173_v8 = vadd.f32 %v1156_v53, %v975_v25 }
 0x10f   :  { %1345 = vst.msk [vmem:[#allocation7 + $0x8] sm:$0xff] %vm1343_vm10, %v1336_v52  ;;  %v1282_v9 = vpop.f32.mrf.mxu0 }
 0x110   :  { %v1299_v12 = vadd.f32 %v1282_v9, %v1173_v8  ;;  %v960_v15 = vpop.f32.mrf.mxu2 }
 0x111   :  { %v976_v51 = vadd.f32 %v960_v15, %v889_v13 }
 0x112   :  { %v1311_v28 = vadd.f32 %v2007_v23, %v1299_v12 }
 0x114   :  { %vm1320_vm12 = vcmp.ge.f32.partialorder %v1311_v28, 0.0  ;;  %v1329_v43 = vmul.f32 %v2012_v33, %v1311_v28  ;;  %v878_v29 = vpop.f32.mrf.mxu1 }
 0x115   :  { %v1158_v19 = vpop.f32.mrf.mxu3  ;;  %v891_v40 = vadd.f32 %v878_v29, %v765_v63 }
 0x116   :  { %v1337_v17 = vsel %vm1320_vm12, %v1311_v28, %v1329_v43  ;;  %v1174_v21 = vadd.f32 %v1158_v19, %v976_v51 }
 0x117   :  { %1346 = vst.msk [vmem:[#allocation7 + $0x10] sm:$0xff] %vm1343_vm10, %v1337_v17  ;;  %v1284_v26 = vpop.f32.mrf.mxu0 }
 0x118   :  { %v1300_v45 = vadd.f32 %v1284_v26, %v1174_v21  ;;  %v963_v27 = vpop.f32.mrf.mxu2 }
 0x119   :  { %v977_v56 = vadd.f32 %v963_v27, %v890_v36 }
 0x11a   :  { %v1312_v37 = vadd.f32 %v2007_v23, %v1300_v45 }
 0x11c   :  { %vm1321_vm13 = vcmp.ge.f32.partialorder %v1312_v37, 0.0  ;;  %v1330_v59 = vmul.f32 %v2012_v33, %v1312_v37  ;;  %v881_v18 = vpop.f32.mrf.mxu1 }
 0x11d   :  { %v1161_v34 = vpop.f32.mrf.mxu3  ;;  %v892_v4 = vadd.f32 %v881_v18, %v766_v2 }
 0x11e   :  { %v1338_v35 = vsel %vm1321_vm13, %v1312_v37, %v1330_v59  ;;  %v1175_v57 = vadd.f32 %v1161_v34, %v977_v56 }
 0x11f   :  { %1347 = vst.msk [vmem:[#allocation7 + $0x18] sm:$0xff] %vm1343_vm10, %v1338_v35  ;;  %v1287_v39 = vpop.f32.mrf.mxu0 }
 0x120   :  { %v1301_v61 = vadd.f32 %v1287_v39, %v1175_v57  ;;  %v965_v41 = vpop.f32.mrf.mxu2 }
 0x121   :  { %v978_v58 = vadd.f32 %v965_v41, %v891_v40 }
 0x122   :  { %v1313_v31 = vadd.f32 %v2007_v23, %v1301_v61 }
 0x124   :  { %vm1322_vm14 = vcmp.ge.f32.partialorder %v1313_v31, 0.0  ;;  %v1331_v1 = vmul.f32 %v2012_v33, %v1313_v31  ;;  %v883_v54 = vpop.f32.mrf.mxu1 }
 0x125   :  { %v1163_v48 = vpop.f32.mrf.mxu3  ;;  %v893_v9 = vadd.f32 %v883_v54, %v767_v20 }
 0x126   :  { %v1339_v49 = vsel %vm1322_vm14, %v1313_v31, %v1331_v1  ;;  %v1176_v50 = vadd.f32 %v1163_v48, %v978_v58 }
 0x127   :  { %1348 = vst.msk [vmem:[#allocation7 + $0x20] sm:$0xff] %vm1343_vm10, %v1339_v49  ;;  %v1289_v3 = vpop.f32.mrf.mxu0 }
 0x128   :  { %v1302_v14 = vadd.f32 %v1289_v3, %v1176_v50  ;;  %v968_v25 = vpop.f32.mrf.mxu2 }
 0x129   :  { %v979_v62 = vadd.f32 %v968_v25, %v892_v4 }
 0x12a   :  { %v1314_v38 = vadd.f32 %v2007_v23, %v1302_v14 }
 0x12c   :  { %vm1323_vm15 = vcmp.ge.f32.partialorder %v1314_v38, 0.0  ;;  %v1332_v60 = vmul.f32 %v2012_v33, %v1314_v38 }
 0x12d   :  { %v1166_v53 = vpop.f32.mrf.mxu3 }
 0x12e   :  { %v1340_v5 = vsel %vm1323_vm15, %v1314_v38, %v1332_v60  ;;  %v1177_v52 = vadd.f32 %v1166_v53, %v979_v62 }
 0x12f   :  { %1349 = vst.msk [vmem:[#allocation7 + $0x28] sm:$0xff] %vm1343_vm10, %v1340_v5  ;;  %v1292_v8 = vpop.f32.mrf.mxu0 }
 0x130   :  { %v1303_v11 = vadd.f32 %v1292_v8, %v1177_v52  ;;  %v970_v55 = vpop.f32.mrf.mxu2 }
 0x131   :  { %v980_v12 = vadd.f32 %v970_v55, %v893_v9 }
 0x132   :  { %v1315_v6 = vadd.f32 %v2007_v23, %v1303_v11 }
 0x134   :  { %vm1324_vm0 = vcmp.ge.f32.partialorder %v1315_v6, 0.0  ;;  %v1333_v13 = vmul.f32 %v2012_v33, %v1315_v6 }
 0x135   :  { %v1168_v15 = vpop.f32.mrf.mxu3 }
 0x136   :  { %v1341_v24 = vsel %vm1324_vm0, %v1315_v6, %v1333_v13  ;;  %v1178_v28 = vadd.f32 %v1168_v15, %v980_v12 }
 0x137   :  { %1350 = vst.msk [vmem:[#allocation7 + $0x30] sm:$0xff] %vm1343_vm10, %v1341_v24  ;;  %v1294_v51 = vpop.f32.mrf.mxu0 }
 0x138   :  { %v1304_v16 = vadd.f32 %v1294_v51, %v1178_v28 }
 0x13a   :  { %v1316_v10 = vadd.f32 %v2007_v23, %v1304_v16 }
 0x13c   :  { %vm1325_vm1 = vcmp.ge.f32.partialorder %v1316_v10, 0.0  ;;  %v1334_v43 = vmul.f32 %v2012_v33, %v1316_v10 }
 0x13e   :  { %v1342_v19 = vsel %vm1325_vm1, %v1316_v10, %v1334_v43 }
 0x13f   :  { %1351 = vst.msk [vmem:[#allocation7 + $0x38] sm:$0xff] %vm1343_vm10, %v1342_v19 }
 0x140   :  { %1364 = dma.vmem_to_hbm [thread:$0]  %s1357_s4, 1024, %s1359_s28, [#allocation6], %s1619_s29, %s1619_s29, %s1620_s1  }
 0x141   :  { %1613 = dma.done.wait [#allocation6], 1024  }
 0x142   :  { %1614 = vsyncadd [#allocation6], 4294966272 }
 0x143   :  { %1369 = vsyncpa [#allocation5], 1 }
 0x144   :  { %1370 = vsyncpa [#allocation6], 1 }

</bundles_post_ra>
